<compile_context>
chip_gen: v5e
topology: v5e:2x2
jax: 0.10.0
libtpu: 0.0.40
codegen_flags: <defaults>
</compile_context>

<pallas_src>
import functools

import jax
import jax.numpy as jnp
from jax import lax
from jax.experimental import pallas as pl
from jax.experimental.pallas import tpu as pltpu


def _round_up(v: int, m: int) -> int:
    return (v + m - 1) // m * m


def _corr_conv_kernel(x_ref, t_ref, w_ref, b_ref, corr_ref, out_ref,
                      *, num, cl, cl_pad):
    # x_ref: (TB, tw, num)         t_ref: (TB, tw, num*cl)  (lane j = n*cl + c)
    # w_ref: (cl_pad, cl_pad)      b_ref: (1, cl_pad)
    # corr_ref / out_ref: (TB, cl_pad)
    x = x_ref[...]                       # f32 (TB, tw, num)
    tf = t_ref[...]                      # f32 (TB, tw, num*cl)
    tb = x.shape[0]

    # Reductions over the time axis (axis=1 == sublanes).
    corr_tt = jnp.sum(tf * tf, axis=1)            # (TB, num*cl)
    corr_xx = jnp.sum(x * x, axis=1)              # (TB, num)
    inv_tt = lax.rsqrt(corr_tt)                   # EUP
    inv_xx = lax.rsqrt(corr_xx)                   # EUP

    # Accumulate the per-channel (num) mean; num is small & static -> unrolled.
    acc = jnp.zeros((tb, cl), jnp.float32)
    for n in range(num):
        xn = x[:, :, n:n + 1]                     # (TB, tw, 1) lane-broadcast over cl
        tn = tf[:, :, n * cl:(n + 1) * cl]        # (TB, tw, cl) static lane slice
        xt = jnp.sum(xn * tn, axis=1)             # (TB, cl)
        acc = acc + xt * inv_tt[:, n * cl:(n + 1) * cl] * inv_xx[:, n:n + 1]

    corr_mean = acc * (1.0 / num)                 # (TB, cl)

    # Lane-dense corr tile: pad cl up to cl_pad (multiple of 128) -> unmasked vst.
    if cl_pad > cl:
        pad = jnp.zeros((tb, cl_pad - cl), jnp.float32)
        corr_full = jnp.concatenate([corr_mean, pad], axis=1)
    else:
        corr_full = corr_mean
    corr_ref[...] = corr_full

    # Fused Conv2d((5,1), pad=(2,0)) along cl as a banded matmul on the MXU.
    out_ref[...] = jnp.dot(corr_full, w_ref[...],
                           preferred_element_type=jnp.float32) + b_ref[...]


def _band_matrix(w_tap, cl, cl_pad):
    # W[i, j] = w[i - j + 2] for |i - j| <= 2, else 0, so that
    # out[j] = sum_i corr[i] * W[i, j]  ==  5-tap conv with zero padding 2.
    idx = jnp.arange(cl)
    diff = idx[:, None] - idx[None, :] + 2
    valid = (diff >= 0) & (diff < 5)
    band = jnp.where(valid, w_tap[jnp.clip(diff, 0, 4)], 0.0).astype(jnp.float32)
    return jnp.zeros((cl_pad, cl_pad), jnp.float32).at[:cl, :cl].set(band)


def _vmem_bytes(tb, tw, num, cl, cl_pad):
    # Padded, double-buffered working-set estimate (f32).
    tw_p = _round_up(tw, 8)
    t_lanes = _round_up(num * cl, 128)
    x_lanes = _round_up(num, 128)
    in_bytes = tb * tw_p * (t_lanes + x_lanes) * 4
    w_bytes = (cl_pad * cl_pad + 8 * cl_pad) * 4
    out_bytes = 2 * tb * cl_pad * 4
    return 2 * (in_bytes + w_bytes + out_bytes)


def siamca_corr_head(x, t, conv_weight, conv_bias, *, tw, num, cl, tb_max=128):
    """Fused multi_ch_Corr + Conv2d((5,1), pad=(2,0)) head.

    Returns (out, corr), each (B, cl), matching SiamCA.forward's tail.
    """
    x_ = jnp.reshape(x, (-1, tw, num)).astype(jnp.float32)
    # Flatten (num, cl) onto the lane axis: lane j = n*cl + c (row-major reshape).
    t_ = jnp.reshape(t, (-1, tw, num * cl)).astype(jnp.float32)
    B = x_.shape[0]
    assert t_.shape[0] == B, "x and t imply different batch sizes"

    cl_pad = _round_up(cl, 128)

    w_tap = jnp.reshape(conv_weight, (-1,)).astype(jnp.float32)          # (5,)
    w_mat = _band_matrix(w_tap, cl, cl_pad)                              # (cl_pad, cl_pad)
    b_row = jnp.zeros((1, cl_pad), jnp.float32).at[0, :cl].set(
        jnp.asarray(conv_bias, jnp.float32).reshape(()))

    # Batch tile: multiple of 8 (clean out-block sublanes), capped by tb_max,
    # and sized so the grid has >=2 steps when the batch allows (v7x: 2 TCs).
    half = -(-B // 2)
    tb = max(8, min(tb_max, _round_up(half, 8)))
    Bp = _round_up(B, tb)
    if Bp != B:
        # Pad with ones so the rsqrt normalization stays finite in dropped rows.
        x_ = jnp.concatenate(
            [x_, jnp.ones((Bp - B, tw, num), jnp.float32)], axis=0)
        t_ = jnp.concatenate(
            [t_, jnp.ones((Bp - B, tw, num * cl), jnp.float32)], axis=0)

    grid = (Bp // tb,)
    kernel = functools.partial(_corr_conv_kernel, num=num, cl=cl, cl_pad=cl_pad)

    vmem_limit = max(32 * 1024 * 1024,
                     int(_vmem_bytes(tb, tw, num, cl, cl_pad) * 1.25))

    corr_p, out_p = pl.pallas_call(
        kernel,
        out_shape=(jax.ShapeDtypeStruct((Bp, cl_pad), jnp.float32),
                   jax.ShapeDtypeStruct((Bp, cl_pad), jnp.float32)),
        grid_spec=pltpu.PrefetchScalarGridSpec(
            num_scalar_prefetch=0,
            grid=grid,
            in_specs=[
                pl.BlockSpec((tb, tw, num), lambda b: (b, 0, 0)),
                pl.BlockSpec((tb, tw, num * cl), lambda b: (b, 0, 0)),
                pl.BlockSpec((cl_pad, cl_pad), lambda b: (0, 0)),
                pl.BlockSpec((1, cl_pad), lambda b: (0, 0)),
            ],
            out_specs=(
                pl.BlockSpec((tb, cl_pad), lambda b: (b, 0)),
                pl.BlockSpec((tb, cl_pad), lambda b: (b, 0)),
            ),
        ),
        compiler_params=pltpu.CompilerParams(
            dimension_semantics=("parallel",),
            vmem_limit_bytes=vmem_limit,
        ),
    )(x_, t_, w_mat, b_row)

    return out_p[:B, :cl], corr_p[:B, :cl]


def _reference(x, t, w, b, *, tw, num, cl):
    x_ = jnp.reshape(x, (-1, tw, num, 1)).astype(jnp.float32)
    t_ = jnp.reshape(t, (-1, tw, num, cl)).astype(jnp.float32)
    corr_xt = jnp.sum(x_ * t_, axis=1)
    corr_xx = jnp.sum(x_ * x_, axis=1)
    corr_tt = jnp.sum(t_ * t_, axis=1)
    corr = jnp.mean(corr_xt / jnp.sqrt(corr_tt) / jnp.sqrt(corr_xx), axis=1)  # (B, cl)
    w = jnp.reshape(w, (-1,)).astype(jnp.float32)
    pad = jnp.pad(corr, ((0, 0), (2, 2)))
    out = jnp.asarray(b, jnp.float32) + sum(w[k] * pad[:, k:k + cl] for k in range(5))
    return out, corr


if __name__ == "__main__":
    key = jax.random.PRNGKey(0)
    kx, kt, kw, kb, k1, k2 = jax.random.split(key, 6)

    # Shared conv parameters (5-tap filter + bias).
    conv_w = jax.random.normal(kw, (5,), dtype=jnp.float32) * 0.3
    conv_b = jax.random.normal(kb, (), dtype=jnp.float32) * 0.1

    # 1) Small, module-consistent shapes.
    B, tw, num, cl = 2, 16, 4, 8
    x = jax.random.normal(kx, (B, tw, num), dtype=jnp.float32)
    t = jax.random.normal(kt, (B, tw, num, cl), dtype=jnp.float32) + 0.5

    out, corr = siamca_corr_head(x, t, conv_w, conv_b, tw=tw, num=num, cl=cl)
    out = jax.block_until_ready(out)
    corr = jax.block_until_ready(corr)
    ref_out, ref_corr = _reference(x, t, conv_w, conv_b, tw=tw, num=num, cl=cl)
    assert out.shape == (B, cl) and corr.shape == (B, cl)
    assert jnp.allclose(corr, ref_corr, atol=1e-4, rtol=1e-4), \
        float(jnp.max(jnp.abs(corr - ref_corr)))
    assert jnp.allclose(out, ref_out, atol=1e-4, rtol=1e-4), \
        float(jnp.max(jnp.abs(out - ref_out)))

    # 2) Production-like SiamCA sizes (tw=50, num=9, cl=40); batch not a
    #    multiple of the tile -> exercises batch padding and a multi-step grid.
    B2, tw2, num2, cl2 = 10, 50, 9, 40
    x2 = jax.random.normal(k1, (B2, tw2, num2), dtype=jnp.float32)
    t2 = jax.random.normal(k2, (B2, tw2, num2, cl2), dtype=jnp.float32) + 0.5

    out2, corr2 = siamca_corr_head(x2, t2, conv_w, conv_b, tw=tw2, num=num2, cl=cl2)
    out2 = jax.block_until_ready(out2)
    corr2 = jax.block_until_ready(corr2)
    ref_out2, ref_corr2 = _reference(x2, t2, conv_w, conv_b,
                                     tw=tw2, num=num2, cl=cl2)
    assert out2.shape == (B2, cl2) and corr2.shape == (B2, cl2)
    assert jnp.allclose(corr2, ref_corr2, atol=1e-4, rtol=1e-4), \
        float(jnp.max(jnp.abs(corr2 - ref_corr2)))
    assert jnp.allclose(out2, ref_out2, atol=1e-4, rtol=1e-4), \
        float(jnp.max(jnp.abs(out2 - ref_out2)))

    print("KERNEL_OK")
</pallas_src>

<mosaic_0001>
module attributes {stable_mosaic.version = 11 : i64} {
  func.func @_corr_conv_kernel(%arg0: i32, %arg1: memref<8x16x4xf32, #tpu.memory_space<vmem>>, %arg2: memref<8x16x32xf32, #tpu.memory_space<vmem>>, %arg3: memref<128x128xf32, #tpu.memory_space<vmem>>, %arg4: memref<1x128xf32, #tpu.memory_space<vmem>>, %arg5: memref<8x128xf32, #tpu.memory_space<vmem>>, %arg6: memref<8x128xf32, #tpu.memory_space<vmem>>) attributes {dimension_semantics = [#tpu.dimension_semantics<parallel>], iteration_bounds = array<i64: 1>, scalar_prefetch = 0 : i64, scratch_operands = 0 : i64, tpu.core_type = #tpu.core_type<tc>, window_params = [{transform_indices = @transform_0, window_bounds = array<i64: 8, 16, 4>}, {transform_indices = @transform_1, window_bounds = array<i64: 8, 16, 32>}, {pipeline_mode = #tpu.pipeline_mode<synchronous>, transform_indices = @transform_2, window_bounds = array<i64: 128, 128>}, {pipeline_mode = #tpu.pipeline_mode<synchronous>, transform_indices = @transform_3, window_bounds = array<i64: 1, 128>}, {transform_indices = @transform_4, window_bounds = array<i64: 8, 128>}, {transform_indices = @transform_5, window_bounds = array<i64: 8, 128>}]} {
    %c0 = arith.constant 0 : index
    %c0_0 = arith.constant 0 : index
    %c0_1 = arith.constant 0 : index
    %0 = vector.load %arg1[%c0, %c0_0, %c0_1] : memref<8x16x4xf32, #tpu.memory_space<vmem>>, vector<8x16x4xf32>
    %c0_2 = arith.constant 0 : index
    %c0_3 = arith.constant 0 : index
    %c0_4 = arith.constant 0 : index
    %1 = vector.load %arg2[%c0_2, %c0_3, %c0_4] : memref<8x16x32xf32, #tpu.memory_space<vmem>>, vector<8x16x32xf32>
    %2 = arith.mulf %1, %1 : vector<8x16x32xf32>
    %cst = arith.constant dense<0.000000e+00> : vector<8x32xf32>
    %3 = vector.multi_reduction <add>, %2, %cst [1] : vector<8x16x32xf32> to vector<8x32xf32>
    %4 = arith.mulf %0, %0 : vector<8x16x4xf32>
    %cst_5 = arith.constant dense<0.000000e+00> : vector<8x4xf32>
    %5 = vector.multi_reduction <add>, %4, %cst_5 [1] : vector<8x16x4xf32> to vector<8x4xf32>
    %6 = math.rsqrt %3 : vector<8x32xf32>
    %7 = math.rsqrt %5 : vector<8x4xf32>
    %cst_6 = arith.constant 0.000000e+00 : f32
    %8 = vector.broadcast %cst_6 : f32 to vector<8x8xf32>
    %9 = vector.extract_strided_slice %0 {offsets = [0, 0, 0], sizes = [8, 16, 1], strides = [1, 1, 1]} : vector<8x16x4xf32> to vector<8x16x1xf32>
    %10 = vector.extract_strided_slice %1 {offsets = [0, 0, 0], sizes = [8, 16, 8], strides = [1, 1, 1]} : vector<8x16x32xf32> to vector<8x16x8xf32>
    %11 = vector.broadcast %9 : vector<8x16x1xf32> to vector<8x16x8xf32>
    %12 = arith.mulf %11, %10 : vector<8x16x8xf32>
    %cst_7 = arith.constant dense<0.000000e+00> : vector<8x8xf32>
    %13 = vector.multi_reduction <add>, %12, %cst_7 [1] : vector<8x16x8xf32> to vector<8x8xf32>
    %14 = vector.extract_strided_slice %6 {offsets = [0, 0], sizes = [8, 8], strides = [1, 1]} : vector<8x32xf32> to vector<8x8xf32>
    %15 = arith.mulf %13, %14 : vector<8x8xf32>
    %16 = vector.extract_strided_slice %7 {offsets = [0, 0], sizes = [8, 1], strides = [1, 1]} : vector<8x4xf32> to vector<8x1xf32>
    %17 = vector.broadcast %16 : vector<8x1xf32> to vector<8x8xf32>
    %18 = arith.mulf %15, %17 : vector<8x8xf32>
    %19 = arith.addf %8, %18 : vector<8x8xf32>
    %20 = vector.extract_strided_slice %0 {offsets = [0, 0, 1], sizes = [8, 16, 1], strides = [1, 1, 1]} : vector<8x16x4xf32> to vector<8x16x1xf32>
    %21 = vector.extract_strided_slice %1 {offsets = [0, 0, 8], sizes = [8, 16, 8], strides = [1, 1, 1]} : vector<8x16x32xf32> to vector<8x16x8xf32>
    %22 = vector.broadcast %20 : vector<8x16x1xf32> to vector<8x16x8xf32>
    %23 = arith.mulf %22, %21 : vector<8x16x8xf32>
    %cst_8 = arith.constant dense<0.000000e+00> : vector<8x8xf32>
    %24 = vector.multi_reduction <add>, %23, %cst_8 [1] : vector<8x16x8xf32> to vector<8x8xf32>
    %25 = vector.extract_strided_slice %6 {offsets = [0, 8], sizes = [8, 8], strides = [1, 1]} : vector<8x32xf32> to vector<8x8xf32>
    %26 = arith.mulf %24, %25 : vector<8x8xf32>
    %27 = vector.extract_strided_slice %7 {offsets = [0, 1], sizes = [8, 1], strides = [1, 1]} : vector<8x4xf32> to vector<8x1xf32>
    %28 = vector.broadcast %27 : vector<8x1xf32> to vector<8x8xf32>
    %29 = arith.mulf %26, %28 : vector<8x8xf32>
    %30 = arith.addf %19, %29 : vector<8x8xf32>
    %31 = vector.extract_strided_slice %0 {offsets = [0, 0, 2], sizes = [8, 16, 1], strides = [1, 1, 1]} : vector<8x16x4xf32> to vector<8x16x1xf32>
    %32 = vector.extract_strided_slice %1 {offsets = [0, 0, 16], sizes = [8, 16, 8], strides = [1, 1, 1]} : vector<8x16x32xf32> to vector<8x16x8xf32>
    %33 = vector.broadcast %31 : vector<8x16x1xf32> to vector<8x16x8xf32>
    %34 = arith.mulf %33, %32 : vector<8x16x8xf32>
    %cst_9 = arith.constant dense<0.000000e+00> : vector<8x8xf32>
    %35 = vector.multi_reduction <add>, %34, %cst_9 [1] : vector<8x16x8xf32> to vector<8x8xf32>
    %36 = vector.extract_strided_slice %6 {offsets = [0, 16], sizes = [8, 8], strides = [1, 1]} : vector<8x32xf32> to vector<8x8xf32>
    %37 = arith.mulf %35, %36 : vector<8x8xf32>
    %38 = vector.extract_strided_slice %7 {offsets = [0, 2], sizes = [8, 1], strides = [1, 1]} : vector<8x4xf32> to vector<8x1xf32>
    %39 = vector.broadcast %38 : vector<8x1xf32> to vector<8x8xf32>
    %40 = arith.mulf %37, %39 : vector<8x8xf32>
    %41 = arith.addf %30, %40 : vector<8x8xf32>
    %42 = vector.extract_strided_slice %0 {offsets = [0, 0, 3], sizes = [8, 16, 1], strides = [1, 1, 1]} : vector<8x16x4xf32> to vector<8x16x1xf32>
    %43 = vector.extract_strided_slice %1 {offsets = [0, 0, 24], sizes = [8, 16, 8], strides = [1, 1, 1]} : vector<8x16x32xf32> to vector<8x16x8xf32>
    %44 = vector.broadcast %42 : vector<8x16x1xf32> to vector<8x16x8xf32>
    %45 = arith.mulf %44, %43 : vector<8x16x8xf32>
    %cst_10 = arith.constant dense<0.000000e+00> : vector<8x8xf32>
    %46 = vector.multi_reduction <add>, %45, %cst_10 [1] : vector<8x16x8xf32> to vector<8x8xf32>
    %47 = vector.extract_strided_slice %6 {offsets = [0, 24], sizes = [8, 8], strides = [1, 1]} : vector<8x32xf32> to vector<8x8xf32>
    %48 = arith.mulf %46, %47 : vector<8x8xf32>
    %49 = vector.extract_strided_slice %7 {offsets = [0, 3], sizes = [8, 1], strides = [1, 1]} : vector<8x4xf32> to vector<8x1xf32>
    %50 = vector.broadcast %49 : vector<8x1xf32> to vector<8x8xf32>
    %51 = arith.mulf %48, %50 : vector<8x8xf32>
    %52 = arith.addf %41, %51 : vector<8x8xf32>
    %cst_11 = arith.constant 2.500000e-01 : f32
    %53 = vector.broadcast %cst_11 : f32 to vector<8x8xf32>
    %54 = arith.mulf %52, %53 : vector<8x8xf32>
    %cst_12 = arith.constant 0.000000e+00 : f32
    %55 = vector.broadcast %cst_12 : f32 to vector<8x120xf32>
    %56 = tpu.concatenate %54, %55 in 1 : vector<8x8xf32>, vector<8x120xf32> -> vector<8x128xf32>
    %c0_13 = arith.constant 0 : index
    %c0_14 = arith.constant 0 : index
    %57 = vector.load %arg5[%c0_13, %c0_14] : memref<8x128xf32, #tpu.memory_space<vmem>>, vector<8x128xf32>
    tpu.vector_store %arg5[%c0_13, %c0_14], %56 {strides = array<i32>} : memref<8x128xf32, #tpu.memory_space<vmem>>, vector<8x128xf32>,
    %c0_15 = arith.constant 0 : index
    %c0_16 = arith.constant 0 : index
    %58 = vector.load %arg3[%c0_15, %c0_16] : memref<128x128xf32, #tpu.memory_space<vmem>>, vector<128x128xf32>
    %cst_17 = arith.constant dense<0.000000e+00> : vector<8x128xf32>
    %59 = tpu.matmul %56, %58, %cst_17 {dimension_numbers = #tpu.dot_dimension_numbers<[1], [0], [0], [1], [0, 0, 1, 1], [], []>} : vector<8x128xf32>, vector<128x128xf32>, vector<8x128xf32> -> vector<8x128xf32>
    %c0_18 = arith.constant 0 : index
    %c0_19 = arith.constant 0 : index
    %60 = vector.load %arg4[%c0_18, %c0_19] : memref<1x128xf32, #tpu.memory_space<vmem>>, vector<1x128xf32>
    %61 = vector.broadcast %60 : vector<1x128xf32> to vector<8x128xf32>
    %62 = arith.addf %59, %61 : vector<8x128xf32>
    %c0_20 = arith.constant 0 : index
    %c0_21 = arith.constant 0 : index
    %63 = vector.load %arg6[%c0_20, %c0_21] : memref<8x128xf32, #tpu.memory_space<vmem>>, vector<8x128xf32>
    tpu.vector_store %arg6[%c0_20, %c0_21], %62 {strides = array<i32>} : memref<8x128xf32, #tpu.memory_space<vmem>>, vector<8x128xf32>,
    return
  }
  func.func @transform_0(%arg0: i32) -> (i32, i32, i32) {
    %c0_i32 = arith.constant 0 : i32
    %c0_i32_0 = arith.constant 0 : i32
    %c0_i32_1 = arith.constant 0 : i32
    return %arg0, %c0_i32, %c0_i32_0 : i32, i32, i32
  }
  func.func @transform_1(%arg0: i32) -> (i32, i32, i32) {
    %c0_i32 = arith.constant 0 : i32
    %c0_i32_0 = arith.constant 0 : i32
    %c0_i32_1 = arith.constant 0 : i32
    return %arg0, %c0_i32, %c0_i32_0 : i32, i32, i32
  }
  func.func @transform_2(%arg0: i32) -> (i32, i32) {
    %c0_i32 = arith.constant 0 : i32
    %c0_i32_0 = arith.constant 0 : i32
    %c0_i32_1 = arith.constant 0 : i32
    return %c0_i32, %c0_i32_0 : i32, i32
  }
  func.func @transform_3(%arg0: i32) -> (i32, i32) {
    %c0_i32 = arith.constant 0 : i32
    %c0_i32_0 = arith.constant 0 : i32
    %c0_i32_1 = arith.constant 0 : i32
    return %c0_i32, %c0_i32_0 : i32, i32
  }
  func.func @transform_4(%arg0: i32) -> (i32, i32) {
    %c0_i32 = arith.constant 0 : i32
    %c0_i32_0 = arith.constant 0 : i32
    return %arg0, %c0_i32 : i32, i32
  }
  func.func @transform_5(%arg0: i32) -> (i32, i32) {
    %c0_i32 = arith.constant 0 : i32
    %c0_i32_0 = arith.constant 0 : i32
    return %arg0, %c0_i32 : i32, i32
  }
}

</mosaic_0001>

<bundles_post_ra>
// kernel: tpu_custom_call.1
= control target key start
LH: loop header
LB: loop body
LE: loop exit
PB: predicated region body
PF: predicated region fallthrough
CT: control target
= control target key end

     0   :  { %11 = vsyncpa [#allocation3], 0  ;;  %s2670_s0 = inlined_call_operand.vmem [shape: f32[8,16,4], index: 0, kind: input, shape index: {}]   ;;  %s2671_s1 = inlined_call_operand.vmem [shape: f32[8,16,32], index: 1, kind: input, shape index: {}]   ;;  %s2672_s2 = inlined_call_operand.hbm [shape: f32[128,128], index: 2, kind: input, shape index: {}]   ;;  %s2673_s3 = inlined_call_operand.vmem [shape: f32[1,128], index: 3, kind: input, shape index: {}]   ;;  %s2674_s4 = inlined_call_operand.hbm [shape: f32[8,128], index: 4, kind: output, shape index: {0}]   ;;  %s2675_s5 = inlined_call_operand.hbm [shape: f32[8,128], index: 5, kind: output, shape index: {1}]  }
   0x1   :  { %12 = vsyncpa [#allocation4], 0 }
   0x2   :  { %13 = vsyncpa [#allocation7], 0  ;;  %s22_s20 = sshll.u32 %s2672_s2, 4  ;;  %s1652_s21 = smov [#allocation2]   ;;  %s23_s20 = int_to_ptr.hbm [resolvable:$true] %s22_s20 }
   0x3   :  { %s24_s22 = sshll.u32 %s1652_s21, 4  ;;  %s1653_s23 = smov 128   ;;  %s25_s22 = int_to_ptr.vmem [resolvable:$true] %s24_s22 }
   0x4   :  { %s1654_s24 = smov 8  }
   0x5   :  { %30 = dma.hbm_to_vmem [thread:$0]  %s23_s20, 2048, %s25_s22, [#allocation3], %s1653_s23, %s1653_s23, %s1654_s24  }
   0x6   :  { %1646 = dma.done.wait [#allocation3], 2048  }
   0x7   :  { %1647 = vsyncadd [#allocation3], 4294965248  ;;  %v1655_v0 = vmov 0   ;;  %v1700_v1 = vld [vmem:[%s2670_s0 + $0x20] sm:$0xff]  ;;  %vm174_vm0 = vcmask 31744   ;;  %v1705_v2 = vld [vmem:[%s2670_s0 + $0x10] sm:$0xff] }
   0x8   :  { %1492 = vset.pattern.permute.xlu2 %v1655_v0  ;;  %1491 = vset.pattern.permute.xlu1 %v1655_v0  ;;  %v1710_v3 = vld [vmem:[%s2670_s0] sm:$0xff]  ;;  %v162_v4 = vmul.f32 %v1700_v1, %v1700_v1  ;;  %v160_v5 = vmul.f32 %v1705_v2, %v1705_v2  ;;  %v1723_v7 = vld [vmem:[%s2670_s0 + $0x28] sm:$0xff]  ;;  %v1728_v8 = vld [vmem:[%s2670_s0 + $0x18] sm:$0xff]  ;;  %s1658_s15 = smov 120   ;;  %s1660_s22 = smov 112  }
   0x9   :  { %1490 = vset.pattern.permute.xlu0 %v1655_v0  ;;  %429 = vperm.xlu2 %1492, %v1700_v1   ;;  %v158_v6 = vmul.f32 %v1710_v3, %v1710_v3  ;;  %v1733_v9 = vld [vmem:[%s2670_s0 + $0x8] sm:$0xff]  ;;  %v163_v10 = vmul.f32 %v1723_v7, %v1723_v7  ;;  %v161_v11 = vmul.f32 %v1728_v8, %v1728_v8  ;;  %v1745_v13 = vld [vmem:[%s2670_s0 + $0x40] sm:$0xff]  ;;  %v1750_v14 = vld [vmem:[%s2670_s0 + $0x38] sm:$0xff]  ;;  %s1662_s23 = smov [#allocation5]   ;;  %s1451_s2 = sshll.u32 %s2674_s4, 4  ;;  %s1452_s2 = int_to_ptr.hbm [resolvable:$true] %s1451_s2 }
   0xa   :  { %419 = vperm.xlu1 %1491, %v1705_v2   ;;  %409 = vperm.xlu0 %1490, %v1710_v3   ;;  %v159_v12 = vmul.f32 %v1733_v9, %v1733_v9  ;;  %v193_v15 = vsel %vm174_vm0, %v162_v4, 0.0  ;;  %v184_v16 = vsel %vm174_vm0, %v160_v5, 0.0  ;;  %v166_v18 = vmul.f32 %v1745_v13, %v1745_v13  ;;  %v1760_v19 = vld [vmem:[%s2670_s0 + $0x30] sm:$0xff]  ;;  %v1765_v20 = vld [vmem:[%s2670_s0 + $0x58] sm:$0xff]  ;;  %v1780_v26 = vld [vmem:[%s2670_s0 + $0x48] sm:$0xff]  ;;  %s1449_s24 = sshll.u32 %s1662_s23, 4  ;;  %s1450_s24 = int_to_ptr.vmem [resolvable:$true] %s1449_s24 }
   0xb   :  { %v175_v17 = vsel %vm174_vm0, %v158_v6, 0.0  ;;  %v1770_v21 = vld [vmem:[%s2670_s0 + $0x50] sm:$0xff]  ;;  %v194_v22 = vsel %vm174_vm0, %v163_v10, 0.0  ;;  %v185_v23 = vsel %vm174_vm0, %v161_v11, 0.0  ;;  %v165_v25 = vmul.f32 %v1750_v14, %v1750_v14  ;;  %v1798_v36 = vld [vmem:[%s2670_s0 + $0x68] sm:$0xff]  ;;  %v1805_v41 = vld [vmem:[%s2670_s0 + $0x60] sm:$0xff] }
   0xc   :  { %v176_v24 = vsel %vm174_vm0, %v159_v12, 0.0  ;;  %v195_v27 = vadd.f32 %v194_v22, %v193_v15  ;;  %v186_v28 = vadd.f32 %v185_v23, %v184_v16  ;;  %v211_v30 = vsel %vm174_vm0, %v166_v18, 0.0  ;;  %v1786_v31 = vld [vmem:[%s2670_s0 + $0x70] sm:$0xff]  ;;  %v1815_v46 = vld [vmem:[%s2670_s0 + $0x78] sm:$0xff]  ;;  %s1663_s29 = smov [#allocation6]   ;;  %s1462_s8 = sshll.u32 %s2675_s5, 4  ;;  %s1463_s8 = int_to_ptr.hbm [resolvable:$true] %s1462_s8 }
   0xd   :  { %v177_v29 = vadd.f32 %v176_v24, %v175_v17  ;;  %v203_v32 = vsel %vm174_vm0, %v165_v25, 0.0  ;;  %v164_v33 = vmul.f32 %v1760_v19, %v1760_v19  ;;  %v169_v34 = vmul.f32 %v1765_v20, %v1765_v20  ;;  %s1460_s30 = sshll.u32 %s1663_s29, 4  ;;  %s1461_s30 = int_to_ptr.vmem [resolvable:$true] %s1460_s30 }
   0xe   :  { %v168_v35 = vmul.f32 %v1770_v21, %v1770_v21  ;;  %v196_v37 = vrot.slane %v195_v27, 4  ;;  %v187_v38 = vrot.slane %v186_v28, 4  ;;  %v167_v40 = vmul.f32 %v1780_v26, %v1780_v26 }
   0xf   :  { %v178_v39 = vrot.slane %v177_v29, 4  ;;  %v202_v42 = vsel %vm174_vm0, %v164_v33, 0.0  ;;  %v221_v43 = vsel %vm174_vm0, %v169_v34, 0.0  ;;  %v172_v45 = vmul.f32 %v1786_v31, %v1786_v31 }
  0x10   :  { %v220_v44 = vsel %vm174_vm0, %v168_v35, 0.0  ;;  %v204_v47 = vadd.f32 %v203_v32, %v202_v42  ;;  %v212_v49 = vsel %vm174_vm0, %v167_v40, 0.0  ;;  %v171_v50 = vmul.f32 %v1798_v36, %v1798_v36 }
  0x11   :  { %434 = vperm.xlu2 %1492, %v1723_v7   ;;  %v222_v48 = vadd.f32 %v221_v43, %v220_v44  ;;  %v213_v51 = vadd.f32 %v212_v49, %v211_v30  ;;  %v238_v52 = vsel %vm174_vm0, %v172_v45, 0.0  ;;  %v170_v53 = vmul.f32 %v1805_v41, %v1805_v41 }
  0x12   :  { %424 = vperm.xlu1 %1491, %v1728_v8   ;;  %414 = vperm.xlu0 %1490, %v1733_v9   ;;  %v188_v54 = vadd.f32 %v187_v38, %v186_v28  ;;  %v205_v55 = vrot.slane %v204_v47, 4  ;;  %v230_v57 = vsel %vm174_vm0, %v171_v50, 0.0  ;;  %v173_v58 = vmul.f32 %v1815_v46, %v1815_v46 }
  0x13   :  { %v223_v56 = vrot.slane %v222_v48, 4  ;;  %v214_v59 = vrot.slane %v213_v51, 4  ;;  %v229_v60 = vsel %vm174_vm0, %v170_v53, 0.0  ;;  %v179_v62 = vadd.f32 %v178_v39, %v177_v29 }
  0x14   :  { %v189_v61 = vrot.slane %v188_v54, 2  ;;  %v231_v63 = vadd.f32 %v230_v57, %v229_v60  ;;  %v239_v0 = vsel %vm174_vm0, %v173_v58, 0.0  ;;  %v197_v4 = vadd.f32 %v196_v37, %v195_v27 }
  0x15   :  { %v206_v5 = vadd.f32 %v205_v55, %v204_v47  ;;  %v240_v10 = vadd.f32 %v239_v0, %v238_v52  ;;  %v180_v11 = vrot.slane %v179_v62, 2  ;;  %v215_v12 = vadd.f32 %v214_v59, %v213_v51 }
  0x16   :  { %v190_v6 = vadd.f32 %v189_v61, %v188_v54  ;;  %v232_v15 = vrot.slane %v231_v63, 4  ;;  %v198_v16 = vrot.slane %v197_v4, 2  ;;  %v224_v18 = vadd.f32 %v223_v56, %v222_v48 }
  0x17   :  { %v207_v17 = vrot.slane %v206_v5, 2  ;;  %v241_v23 = vrot.slane %v240_v10, 4  ;;  %v181_v24 = vadd.f32 %v180_v11, %v179_v62  ;;  %v216_v25 = vrot.slane %v215_v12, 2 }
  0x18   :  { %v191_v22 = vrot.slane %v190_v6, 1  ;;  %v199_v28 = vadd.f32 %v198_v16, %v197_v4  ;;  %v225_v27 = vrot.slane %v224_v18, 2  ;;  %v233_v30 = vadd.f32 %v232_v15, %v231_v63 }
  0x19   :  { %449 = vperm.xlu2 %1492, %v1745_v13   ;;  %v208_v29 = vadd.f32 %v207_v17, %v206_v5  ;;  %v182_v33 = vrot.slane %v181_v24, 1  ;;  %v217_v34 = vadd.f32 %v216_v25, %v215_v12  ;;  %v242_v35 = vadd.f32 %v241_v23, %v240_v10 }
  0x1a   :  { %444 = vperm.xlu1 %1491, %v1750_v14   ;;  %439 = vperm.xlu0 %1490, %v1760_v19   ;;  %v192_v32 = vadd.f32 %v191_v22, %v190_v6  ;;  %v200_v37 = vrot.slane %v199_v28, 1  ;;  %v226_v39 = vadd.f32 %v225_v27, %v224_v18  ;;  %v234_v40 = vrot.slane %v233_v30, 2 }
  0x1b   :  { %v209_v38 = vrot.slane %v208_v29, 1  ;;  %v183_v42 = vadd.f32 %v182_v33, %v181_v24  ;;  %v218_v43 = vrot.slane %v217_v34, 1  ;;  %v243_v47 = vrot.slane %v242_v35, 2 }
  0x1c   :  { %1510 = vrsqrt.f32 %v192_v32  ;;  %v1834_v44 = vadd.f32 %v200_v37, %v199_v28  ;;  %v227_v48 = vrot.slane %v226_v39, 1  ;;  %v235_v50 = vadd.f32 %v234_v40, %v233_v30 }
  0x1d   :  { %v1836_v45 = vadd.f32 %v209_v38, %v208_v29  ;;  %1512 = vrsqrt.f32 %v183_v42  ;;  %v1838_v49 = vadd.f32 %v218_v43, %v217_v34  ;;  %v244_v51 = vadd.f32 %v243_v47, %v242_v35 }
  0x1e   :  { %1514 = vrsqrt.f32 %v1834_v44  ;;  %v1842_v52 = vadd.f32 %v227_v48, %v226_v39  ;;  %v236_v53 = vrot.slane %v235_v50, 1  ;;  %vm343_vm1 = vweird.f32 %v192_v32 }
  0x1f   :  { %1516 = vrsqrt.f32 %v1838_v49  ;;  %v245_v54 = vrot.slane %v244_v51, 1  ;;  %vm333_vm3 = vweird.f32 %v183_v42  ;;  %vm373_vm7 = vweird.f32 %v1838_v49 }
  0x20   :  { %1518 = vrsqrt.f32 %v1836_v45  ;;  %v1849_v56 = vadd.f32 %v236_v53, %v235_v50  ;;  %vm363_vm9 = vweird.f32 %v1836_v45  ;;  %vm353_vm11 = vweird.f32 %v1834_v44 }
  0x21   :  { %464 = vperm.xlu2 %1492, %v1765_v20   ;;  %1520 = vrsqrt.f32 %v1842_v52  ;;  %v1851_v58 = vadd.f32 %v245_v54, %v244_v51 }
  0x22   :  { %459 = vperm.xlu1 %1491, %v1770_v21   ;;  %v1511_v55 = vpop.eup %1510  ;;  %454 = vperm.xlu0 %1490, %v1780_v26   ;;  %1522 = vrsqrt.f32 %v1849_v56 }
  0x23   :  { %v338_v57 = vmul.f32 %v1511_v55, %v192_v32  ;;  %v1513_v59 = vpop.eup %1512  ;;  %1524 = vrsqrt.f32 %v1851_v58  ;;  %vm344_vm2 = vweird.f32 %v1511_v55  ;;  %vm403_vm0 = vweird.f32 %v1851_v58 }
  0x24   :  { %v1854_v60 = vpop.eup %1514  ;;  %v328_v62 = vmul.f32 %v1513_v59, %v183_v42  ;;  %vm334_vm4 = vweird.f32 %v1513_v59  ;;  %vm345_vm5 = vmor %vm343_vm1, %vm344_vm2  ;;  %vm393_vm2 = vweird.f32 %v1849_v56 }
  0x25   :  { %v339_v61 = vmul.f32 %v1511_v55, %v338_v57  ;;  %v1517_v63 = vpop.eup %1516  ;;  %v348_v0 = vmul.f32 %v1854_v60, %v1834_v44  ;;  %vm335_vm6 = vmor %vm333_vm3, %vm334_vm4  ;;  %vm354_vm12 = vweird.f32 %v1854_v60  ;;  %vm383_vm4 = vweird.f32 %v1842_v52 }
  0x26   :  { %v1519_v4 = vpop.eup %1518  ;;  %v329_v6 = vmul.f32 %v1513_v59, %v328_v62  ;;  %v368_v10 = vmul.f32 %v1517_v63, %v1838_v49  ;;  %vm374_vm8 = vweird.f32 %v1517_v63  ;;  %vm355_vm15 = vmor %vm353_vm11, %vm354_vm12 }
  0x27   :  { %v340_v5 = vmul.f32 0.5, %v339_v61  ;;  %v1860_v11 = vpop.eup %1520  ;;  %v349_v12 = vmul.f32 %v1854_v60, %v348_v0  ;;  %v358_v15 = vmul.f32 %v1519_v4, %v1836_v45  ;;  %vm364_vm10 = vweird.f32 %v1519_v4  ;;  %vm375_vm13 = vmor %vm373_vm7, %vm374_vm8 }
  0x28   :  { %v330_v17 = vmul.f32 0.5, %v329_v6  ;;  %v369_v18 = vmul.f32 %v1517_v63, %v368_v10  ;;  %v1866_v22 = vpop.eup %1522  ;;  %v378_v24 = vmul.f32 %v1860_v11, %v1842_v52  ;;  %vm365_vm14 = vmor %vm363_vm9, %vm364_vm10  ;;  %v1656_v52 = vmov 1   ;;  %v1933_v6 = vld [vmem:[%s2671_s1 + $0x18] sm:$0xff]  ;;  %v1944_v10 = vld [vmem:[%s2671_s1] sm:$0xff] }
  0x29   :  { %479 = vperm.xlu2 %1492, %v1786_v31   ;;  %v341_v16 = vsub.f32 1.5, %v340_v5  ;;  %v359_v23 = vmul.f32 %v1519_v4, %v358_v15  ;;  %v1525_v25 = vpop.eup %1524  ;;  %v350_v30 = vmul.f32 0.5, %v349_v12  ;;  %v388_v40 = vmul.f32 %v1866_v22, %v1849_v56  ;;  %v1928_v5 = vld [vmem:[%s2671_s1 + $0x10] sm:$0xff] }
  0x2a   :  { %474 = vperm.xlu1 %1491, %v1798_v36   ;;  %469 = vperm.xlu0 %1490, %v1805_v41   ;;  %v331_v29 = vsub.f32 1.5, %v330_v17  ;;  %v370_v27 = vmul.f32 0.5, %v369_v18  ;;  %v398_v34 = vmul.f32 %v1525_v25, %v1851_v58  ;;  %v379_v42 = vmul.f32 %v1860_v11, %v378_v24 }
  0x2b   :  { %v342_v28 = vmul.f32 %v1511_v55, %v341_v16  ;;  %v360_v33 = vmul.f32 0.5, %v359_v23  ;;  %v351_v47 = vsub.f32 1.5, %v350_v30  ;;  %v389_v48 = vmul.f32 %v1866_v22, %v388_v40 }
  0x2c   :  { %v332_v37 = vmul.f32 %v1513_v59, %v331_v29  ;;  %v371_v32 = vsub.f32 1.5, %v370_v27  ;;  %v399_v39 = vmul.f32 %v1525_v25, %v398_v34  ;;  %vm404_vm1 = vweird.f32 %v1525_v25 }
  0x2d   :  { %v1875_v35 = vsel %vm345_vm5, %v1511_v55, %v342_v28  ;;  %v361_v38 = vsub.f32 1.5, %v360_v33  ;;  %v390_v45 = vmul.f32 0.5, %v389_v48  ;;  %v352_v54 = vmul.f32 %v1854_v60, %v351_v47 }
  0x2e   :  { %v1880_v43 = vsel %vm335_vm6, %v1513_v59, %v332_v37  ;;  %v372_v50 = vmul.f32 %v1517_v63, %v371_v32  ;;  %v400_v53 = vmul.f32 0.5, %v399_v39  ;;  %v380_v55 = vmul.f32 0.5, %v379_v42  ;;  %vm405_vm6 = vmor %vm403_vm0, %vm404_vm1  ;;  %v1997_v32 = vld [vmem:[%s2671_s1 + $0x48] sm:$0xff] }
  0x2f   :  { %2692 = vst [vmem:[#allocation11_spill] sm:$0xff] %v1880_v43  ;;  %v362_v51 = vmul.f32 %v1519_v4, %v361_v38  ;;  %v391_v61 = vsub.f32 1.5, %v390_v45  ;;  %v1898_v62 = vsel %vm355_vm15, %v1854_v60, %v352_v54  ;;  %vm394_vm3 = vweird.f32 %v1866_v22 }
  0x30   :  { %v1893_v57 = vsel %vm375_vm13, %v1517_v63, %v372_v50  ;;  %v401_v44 = vsub.f32 1.5, %v400_v53  ;;  %2695 = vst [vmem:[#allocation14_spill] sm:$0xff] %v1898_v62  ;;  %v381_v49 = vsub.f32 1.5, %v380_v55  ;;  %vm384_vm5 = vweird.f32 %v1860_v11  ;;  %vm395_vm7 = vmor %vm393_vm2, %vm394_vm3 }
  0x31   :  { %591 = vperm.xlu2 %1492, %v1875_v35   ;;  %2693 = vst [vmem:[#allocation12_spill] sm:$0xff] %v1893_v57  ;;  %v1895_v59 = vsel %vm365_vm14, %v1519_v4, %v362_v51  ;;  %v392_v58 = vmul.f32 %v1866_v22, %v391_v61  ;;  %vm385_vm8 = vmor %vm383_vm4, %vm384_vm5  ;;  %vm85_vm9 = vcmask 261120   ;;  %v69_v16 = vmul.f32 %v1944_v10, %v1944_v10  ;;  %v2018_v61 = vld [vmem:[%s2671_s1 + $0x68] sm:$0xff] }
  0x32   :  { %586 = vperm.xlu1 %1491, %v1880_v43   ;;  %484 = vperm.xlu0 %1490, %v1815_v46   ;;  %2694 = vst [vmem:[#allocation13_spill] sm:$0xff] %v1895_v59  ;;  %v402_v60 = vmul.f32 %v1525_v25, %v401_v44  ;;  %v382_v63 = vmul.f32 %v1860_v11, %v381_v49  ;;  %vm503_vm10 = vcmask 64512   ;;  %v2023_v49 = vld [vmem:[%s2671_s1 + $0x60] sm:$0xff] }
  0x33   :  { %v1913_v0 = vsel %vm395_vm7, %v1866_v22, %v392_v58  ;;  %v86_v24 = vsel %vm85_vm9, %v69_v16, 0.0  ;;  %v78_v40 = vmul.f32 %v1997_v32, %v1997_v32 }
  0x34   :  { %v1910_v56 = vsel %vm405_vm6, %v1525_v25, %v402_v60  ;;  %2697 = vst [vmem:[#allocation16_spill] sm:$0xff] %v1913_v0  ;;  %v1916_v4 = vsel %vm385_vm8, %v1860_v11, %v382_v63  ;;  %v1949_v11 = vld [vmem:[%s2671_s1 + $0x8] sm:$0xff] }
  0x35   :  { %2696 = vst [vmem:[#allocation15_spill] sm:$0xff] %v1910_v56  ;;  %v70_v17 = vmul.f32 %v1949_v11, %v1949_v11 }
  0x36   :  { %2698 = vst [vmem:[#allocation17_spill] sm:$0xff] %v1916_v4 }
  0x37   :  { %v87_v25 = vsel %vm85_vm9, %v70_v17, 0.0 }
  0x38   :  { %v88_v30 = vadd.f32 %v87_v25, %v86_v24 }
  0x39   :  { %606 = vperm.xlu2 %1492, %v1893_v57  }
  0x3a   :  { %601 = vperm.xlu1 %1491, %v1895_v59   ;;  %596 = vperm.xlu0 %1490, %v1898_v62   ;;  %v89_v37 = vrot.slane %v88_v30, 4 }
  0x3c   :  { %v90_v50 = vadd.f32 %v89_v37, %v88_v30  ;;  %v2063_v37 = vld [vmem:[%s2671_s1 + $0x78] sm:$0xff] }
  0x3e   :  { %v91_v60 = vrot.slane %v90_v50, 2 }
  0x40   :  { %v92_v17 = vadd.f32 %v91_v60, %v90_v50 }
  0x41   :  { %621 = vperm.xlu2 %1492, %v1910_v56  }
  0x42   :  { %616 = vperm.xlu1 %1491, %v1913_v0   ;;  %611 = vperm.xlu0 %1490, %v1916_v4  }
  0x49   :  { %1495 = vset.pattern.permute.xlu2 %v1656_v52 }
  0x4a   :  { %1494 = vset.pattern.permute.xlu1 %v1656_v52  ;;  %1493 = vset.pattern.permute.xlu0 %v1656_v52 }
  0x4b   :  { %649 = vperm.xlu2 %1495, %v1705_v2   ;;  %641 = vperm.xlu0 %1493, %v1710_v3   ;;  %v71_v3 = vmul.f32 %v1928_v5, %v1928_v5 }
  0x4c   :  { %645 = vperm.xlu1 %1494, %v1733_v9  }
  0x4d   :  { %v95_v12 = vsel %vm85_vm9, %v71_v3, 0.0 }
  0x53   :  { %657 = vperm.xlu2 %1495, %v1700_v1   ;;  %661 = vperm.xlu0 %1493, %v1723_v7   ;;  %v72_v1 = vmul.f32 %v1933_v6, %v1933_v6  ;;  %v1954_v7 = vld [vmem:[%s2671_s1 + $0x20] sm:$0xff] }
  0x54   :  { %653 = vperm.xlu1 %1494, %v1728_v8   ;;  %v1959_v8 = vld [vmem:[%s2671_s1 + $0x28] sm:$0xff]  ;;  %v73_v18 = vmul.f32 %v1954_v7, %v1954_v7 }
  0x55   :  { %v96_v15 = vsel %vm85_vm9, %v72_v1, 0.0  ;;  %v74_v22 = vmul.f32 %v1959_v8, %v1959_v8 }
  0x56   :  { %v97_v23 = vadd.f32 %v96_v15, %v95_v12  ;;  %v104_v28 = vsel %vm85_vm9, %v73_v18, 0.0  ;;  %v2032_v12 = vld [vmem:[%s2671_s1 + $0x50] sm:$0xff]  ;;  %v82_v15 = vmul.f32 %v2018_v61, %v2018_v61 }
  0x57   :  { %v105_v29 = vsel %vm85_vm9, %v74_v22, 0.0  ;;  %v2044_v22 = vld [vmem:[%s2671_s1 + $0x58] sm:$0xff] }
  0x58   :  { %v98_v27 = vrot.slane %v97_v23, 4  ;;  %v106_v33 = vadd.f32 %v105_v29, %v104_v28  ;;  %v80_v25 = vmul.f32 %v2044_v22, %v2044_v22  ;;  %v79_v29 = vmul.f32 %v2032_v12, %v2032_v12 }
  0x5a   :  { %v99_v34 = vadd.f32 %v98_v27, %v97_v23  ;;  %v107_v39 = vrot.slane %v106_v33, 4  ;;  %v141_v27 = vsel %vm85_vm9, %v82_v15, 0.0  ;;  %v131_v50 = vsel %vm85_vm9, %v79_v29, 0.0 }
  0x5b   :  { %669 = vperm.xlu2 %1495, %v1750_v14   ;;  %673 = vperm.xlu0 %1493, %v1745_v13   ;;  %v1981_v14 = vld [vmem:[%s2671_s1 + $0x38] sm:$0xff]  ;;  %v1986_v13 = vld [vmem:[%s2671_s1 + $0x30] sm:$0xff] }
  0x5c   :  { %665 = vperm.xlu1 %1494, %v1760_v19   ;;  %v1992_v19 = vld [vmem:[%s2671_s1 + $0x40] sm:$0xff]  ;;  %v76_v47 = vmul.f32 %v1981_v14, %v1981_v14  ;;  %v100_v42 = vrot.slane %v99_v34, 2  ;;  %v75_v48 = vmul.f32 %v1986_v13, %v1986_v13  ;;  %v108_v51 = vadd.f32 %v107_v39, %v106_v33  ;;  %v2058_v33 = vld [vmem:[%s2671_s1 + $0x70] sm:$0xff] }
  0x5e   :  { %v114_v45 = vsel %vm85_vm9, %v76_v47, 0.0  ;;  %v101_v54 = vadd.f32 %v100_v42, %v99_v34  ;;  %v113_v55 = vsel %vm85_vm9, %v75_v48, 0.0  ;;  %v109_v52 = vrot.slane %v108_v51, 2 }
  0x5f   :  { %v115_v63 = vadd.f32 %v114_v45, %v113_v55  ;;  %v84_v47 = vmul.f32 %v2063_v37, %v2063_v37  ;;  %v132_v48 = vsel %vm85_vm9, %v80_v25, 0.0 }
  0x60   :  { %v102_v1 = vrot.slane %v101_v54, 1  ;;  %v110_v24 = vadd.f32 %v109_v52, %v108_v51 }
  0x61   :  { %v116_v23 = vrot.slane %v115_v63, 4  ;;  %v150_v45 = vsel %vm85_vm9, %v84_v47, 0.0 }
  0x62   :  { %v2048_v28 = vadd.f32 %v102_v1, %v101_v54  ;;  %v111_v42 = vrot.slane %v110_v24, 1 }
  0x63   :  { %681 = vperm.xlu2 %1495, %v1770_v21   ;;  %685 = vperm.xlu0 %1493, %v1765_v20   ;;  %v430_v38 = vpop.permute.xlu2 %429  ;;  %v77_v21 = vmul.f32 %v1992_v19, %v1992_v19 }
  0x64   :  { %677 = vperm.xlu1 %1494, %v1780_v26   ;;  %v123_v26 = vsel %vm85_vm9, %v78_v40, 0.0  ;;  %v491_v53 = vmul.f32 %v430_v38, %v1954_v7  ;;  %v93_v38 = vrot.slane %v92_v17, 1  ;;  %v117_v40 = vadd.f32 %v116_v23, %v115_v63 }
  0x65   :  { %v122_v20 = vsel %vm85_vm9, %v77_v21, 0.0  ;;  %v83_v21 = vmul.f32 %v2058_v33, %v2058_v33  ;;  %1526 = vrsqrt.f32 %v2048_v28  ;;  %vm263_vm11 = vweird.f32 %v2048_v28 }
  0x66   :  { %v124_v44 = vadd.f32 %v123_v26, %v122_v20  ;;  %v2076_v20 = vadd.f32 %v93_v38, %v92_v17  ;;  %v118_v54 = vrot.slane %v117_v40, 2 }
  0x67   :  { %v149_v26 = vsel %vm85_vm9, %v83_v21, 0.0 }
  0x68   :  { %v125_v16 = vrot.slane %v124_v44, 4  ;;  %1528 = vrsqrt.f32 %v2076_v20  ;;  %v119_v1 = vadd.f32 %v118_v54, %v117_v40  ;;  %vm253_vm14 = vweird.f32 %v2076_v20 }
  0x6a   :  { %v126_v34 = vadd.f32 %v125_v16, %v124_v44  ;;  %v2080_v44 = vadd.f32 %v111_v42, %v110_v24  ;;  %v120_v24 = vrot.slane %v119_v1, 1 }
  0x6b   :  { %693 = vperm.xlu2 %1495, %v1798_v36   ;;  %697 = vperm.xlu0 %1493, %v1786_v31   ;;  %v435_v58 = vpop.permute.xlu2 %434  ;;  %v522_v36 = vsel %vm503_vm10, %v491_v53, 0.0  ;;  %v81_v31 = vmul.f32 %v2023_v49, %v2023_v49  ;;  %v133_v53 = vadd.f32 %v132_v48, %v131_v50  ;;  %v2082_v60 = vpop.eup %1526 }
  0x6c   :  { %689 = vperm.xlu1 %1494, %v1805_v41   ;;  %v492_v3 = vmul.f32 %v435_v58, %v1959_v8  ;;  %v151_v58 = vadd.f32 %v150_v45, %v149_v26  ;;  %1530 = vrsqrt.f32 %v2080_v44  ;;  %v2107_v48 = vadd.f32 %v120_v24, %v119_v1 }
  0x6d   :  { %v140_v30 = vsel %vm85_vm9, %v81_v31, 0.0  ;;  %vm264_vm12 = vweird.f32 %v2082_v60  ;;  %vm273_vm1 = vweird.f32 %v2080_v44 }
  0x6e   :  { %v523_v41 = vsel %vm503_vm10, %v492_v3, 0.0  ;;  %v142_v51 = vadd.f32 %v141_v27, %v140_v30  ;;  %v134_v3 = vrot.slane %v133_v53, 4  ;;  %v152_v16 = vrot.slane %v151_v58, 4  ;;  %v2093_v29 = vpop.eup %1528  ;;  %vm265_vm13 = vmor %vm263_vm11, %vm264_vm12 }
  0x6f   :  { %v2039_v18 = vadd.f32 %v523_v41, %v522_v36  ;;  %v258_v41 = vmul.f32 %v2082_v60, %v2048_v28  ;;  %v248_v26 = vmul.f32 %v2093_v29, %v2076_v20  ;;  %vm254_vm15 = vweird.f32 %v2093_v29 }
  0x70   :  { %v143_v55 = vrot.slane %v142_v51, 4  ;;  %v135_v23 = vadd.f32 %v134_v3, %v133_v53  ;;  %v153_v21 = vadd.f32 %v152_v16, %v151_v58  ;;  %vm255_vm0 = vmor %vm253_vm14, %vm254_vm15  ;;  %vm283_vm3 = vweird.f32 %v2107_v48 }
  0x71   :  { %v259_v30 = vmul.f32 %v2082_v60, %v258_v41  ;;  %v249_v16 = vmul.f32 %v2093_v29, %v248_v26  ;;  %v525_v24 = vrot.slane %v2039_v18, 4 }
  0x72   :  { %v144_v31 = vadd.f32 %v143_v55, %v142_v51  ;;  %v136_v50 = vrot.slane %v135_v23, 2  ;;  %v154_v3 = vrot.slane %v153_v21, 2 }
  0x73   :  { %802 = vperm.xlu2 %1495, %v1880_v43   ;;  %806 = vperm.xlu0 %1493, %v1875_v35   ;;  %v2067_v39 = vpop.permute.xlu2 %449  ;;  %v260_v55 = vmul.f32 0.5, %v259_v30  ;;  %v250_v26 = vmul.f32 0.5, %v249_v16 }
  0x74   :  { %701 = vperm.xlu1 %1494, %v1815_v46   ;;  %v127_v46 = vrot.slane %v126_v34, 2  ;;  %v145_v25 = vrot.slane %v144_v31, 2 }
  0x76   :  { %v128_v63 = vadd.f32 %v127_v46, %v126_v34  ;;  %v2097_v34 = vpop.eup %1530  ;;  %v146_v53 = vadd.f32 %v145_v25, %v144_v31  ;;  %v137_v31 = vadd.f32 %v136_v50, %v135_v23 }
  0x77   :  { %v268_v58 = vmul.f32 %v2097_v34, %v2080_v44  ;;  %vm274_vm2 = vweird.f32 %v2097_v34  ;;  %v2690_v44 = vmov 2  }
  0x78   :  { %v129_v17 = vrot.slane %v128_v63, 1  ;;  %vm2222_vm8 = vmor %vm273_vm1, %vm274_vm2 }
  0x7a   :  { %v2101_v40 = vadd.f32 %v129_v17, %v128_v63  ;;  %v147_v17 = vrot.slane %v146_v53, 1 }
  0x7b   :  { %814 = vperm.xlu2 %1495, %v1895_v59   ;;  %818 = vperm.xlu0 %1493, %v1893_v57   ;;  %v2087_v52 = vpop.permute.xlu2 %464 }
  0x7c   :  { %810 = vperm.xlu1 %1494, %v1898_v62   ;;  %v420_v36 = vpop.permute.xlu1 %419  ;;  %v410_v15 = vpop.permute.xlu0 %409  ;;  %1532 = vrsqrt.f32 %v2101_v40  ;;  %v498_v28 = vmul.f32 %v2087_v52, %v2044_v22  ;;  %vm293_vm5 = vweird.f32 %v2101_v40 }
  0x7d   :  { %v487_v27 = vmul.f32 %v410_v15, %v1944_v10  ;;  %v489_v38 = vmul.f32 %v420_v36, %v1928_v5  ;;  %1534 = vrsqrt.f32 %v2107_v48 }
  0x7f   :  { %v504_v45 = vsel %vm503_vm10, %v487_v27, 0.0  ;;  %v513_v63 = vsel %vm503_vm10, %v489_v38, 0.0  ;;  %v269_v27 = vmul.f32 %v2097_v34, %v268_v58  ;;  %v261_v38 = vsub.f32 1.5, %v260_v55 }
  0x83   :  { %826 = vperm.xlu2 %1495, %v1913_v0   ;;  %830 = vperm.xlu0 %1493, %v1910_v56   ;;  %v2105_v47 = vpop.permute.xlu2 %479 }
  0x84   :  { %822 = vperm.xlu1 %1494, %v1916_v4   ;;  %v425_v42 = vpop.permute.xlu1 %424  ;;  %v415_v46 = vpop.permute.xlu0 %414 }
  0x85   :  { %v490_v51 = vmul.f32 %v425_v42, %v1933_v6  ;;  %v488_v54 = vmul.f32 %v415_v46, %v1949_v11  ;;  %v155_v42 = vadd.f32 %v154_v3, %v153_v21  ;;  %v526_v21 = vadd.f32 %v525_v24, %v2039_v18 }
  0x87   :  { %v514_v36 = vsel %vm503_vm10, %v490_v51, 0.0  ;;  %v505_v15 = vsel %vm503_vm10, %v488_v54, 0.0  ;;  %v156_v56 = vrot.slane %v155_v42, 1  ;;  %v527_v52 = vrot.slane %v526_v21, 2 }
  0x88   :  { %v515_v1 = vadd.f32 %v514_v36, %v513_v63  ;;  %v506_v41 = vadd.f32 %v505_v15, %v504_v45  ;;  %v138_v63 = vrot.slane %v137_v31, 1  ;;  %v2125_v36 = vpop.eup %1532  ;;  %v2129_v45 = vadd.f32 %v147_v17, %v146_v53 }
  0x89   :  { %v2131_v58 = vpop.eup %1534  ;;  %v288_v18 = vmul.f32 %v2125_v36, %v2101_v40  ;;  %vm294_vm6 = vweird.f32 %v2125_v36 }
  0x8a   :  { %v516_v25 = vrot.slane %v515_v1, 4  ;;  %v507_v30 = vrot.slane %v506_v41, 4  ;;  %v2142_v17 = vadd.f32 %v138_v63, %v137_v31  ;;  %1536 = vrsqrt.f32 %v2129_v45  ;;  %vm2212_vm7 = vmor %vm293_vm5, %vm294_vm6 }
  0x8b   :  { %v592_v54 = vpop.permute.xlu2 %591  ;;  %vm284_vm4 = vweird.f32 %v2131_v58  ;;  %1497 = vset.pattern.permute.xlu2 %v2690_v44  ;;  %vm313_vm12 = vweird.f32 %v2129_v45  ;;  %vm961_vm5 = vcmask 195712   ;;  %vm1202_vm6 = vcmask 261312  }
  0x8c   :  { %v517_v51 = vadd.f32 %v516_v25, %v515_v1  ;;  %v445_v46 = vpop.permute.xlu1 %444  ;;  %v440_v50 = vpop.permute.xlu0 %439  ;;  %v2135_v1 = vmul.f32 0.5, %v269_v27  ;;  %v508_v15 = vadd.f32 %v507_v30, %v506_v41  ;;  %v251_v27 = vsub.f32 1.5, %v250_v26  ;;  %vm2232_vm9 = vmor %vm283_vm3, %vm284_vm4  ;;  %1496 = vset.pattern.permute.xlu1 %v2690_v44  ;;  %890 = vperm.xlu2 %1497, %v1705_v2  }
  0x8d   :  { %v494_v23 = vmul.f32 %v445_v46, %v1981_v14  ;;  %v493_v3 = vmul.f32 %v440_v50, %v1986_v13  ;;  %v262_v46 = vmul.f32 %v2082_v60, %v261_v38  ;;  %v278_v41 = vmul.f32 %v2131_v58, %v2107_v48  ;;  %886 = vperm.xlu1 %1496, %v1733_v9  }
  0x8e   :  { %v518_v55 = vrot.slane %v517_v51, 2  ;;  %v495_v30 = vmul.f32 %v2067_v39, %v1992_v19  ;;  %v509_v31 = vrot.slane %v508_v15, 2  ;;  %1538 = vrsqrt.f32 %v2142_v17 }
  0x8f   :  { %v532_v25 = vsel %vm503_vm10, %v494_v23, 0.0  ;;  %v531_v16 = vsel %vm503_vm10, %v493_v3, 0.0  ;;  %v2157_v23 = vadd.f32 %v156_v56, %v155_v42  ;;  %v289_v39 = vmul.f32 %v2125_v36, %v288_v18 }
  0x90   :  { %v519_v53 = vadd.f32 %v518_v55, %v517_v51  ;;  %v533_v24 = vadd.f32 %v532_v25, %v531_v16  ;;  %v2155_v51 = vsel %vm265_vm13, %v2082_v60, %v262_v46  ;;  %v252_v60 = vmul.f32 %v2093_v29, %v251_v27 }
  0x91   :  { %v279_v46 = vmul.f32 %v2131_v58, %v278_v41  ;;  %v540_v56 = vsel %vm503_vm10, %v495_v30, 0.0  ;;  %v550_v42 = vsel %vm503_vm10, %v498_v28, 0.0  ;;  %v510_v27 = vadd.f32 %v509_v31, %v508_v15 }
  0x92   :  { %v520_v38 = vrot.slane %v519_v53, 1  ;;  %v534_v63 = vrot.slane %v533_v24, 4  ;;  %1540 = vrsqrt.f32 %v2157_v23  ;;  %vm303_vm11 = vweird.f32 %v2142_v17 }
  0x93   :  { %v2159_v55 = vpop.permute.xlu2 %606  ;;  %v511_v31 = vrot.slane %v510_v27, 1  ;;  %vm323_vm1 = vweird.f32 %v2157_v23  ;;  %vm720_vm4 = vcmask 130112  }
  0x94   :  { %v521_v50 = vadd.f32 %v520_v38, %v519_v53  ;;  %v460_v26 = vpop.permute.xlu1 %459  ;;  %v455_v25 = vpop.permute.xlu0 %454  ;;  %v535_v0 = vadd.f32 %v534_v63, %v533_v24  ;;  %v280_v24 = vmul.f32 0.5, %v279_v46 }
  0x95   :  { %v497_v3 = vmul.f32 %v460_v26, %v2032_v12  ;;  %v496_v16 = vmul.f32 %v455_v25, %v1997_v32  ;;  %v2171_v38 = vpop.eup %1536  ;;  %v271_v25 = vsub.f32 1.5, %v2135_v1  ;;  %v512_v57 = vadd.f32 %v511_v31, %v510_v27 }
  0x96   :  { %v577_v53 = vmul.f32 %v521_v50, %v2155_v51  ;;  %v290_v50 = vmul.f32 0.5, %v289_v39  ;;  %v2183_v63 = vpop.eup %1538  ;;  %v308_v20 = vmul.f32 %v2171_v38, %v2129_v45  ;;  %v528_v39 = vadd.f32 %v527_v52, %v526_v21 }
  0x97   :  { %v549_v18 = vsel %vm503_vm10, %v497_v3, 0.0  ;;  %v541_v28 = vsel %vm503_vm10, %v496_v16, 0.0  ;;  %v2186_v3 = vsel %vm255_vm0, %v2093_v29, %v252_v60  ;;  %vm314_vm13 = vweird.f32 %v2171_v38 }
  0x98   :  { %v2179_v41 = vmul.f32 %v592_v54, %v577_v53  ;;  %v551_v30 = vadd.f32 %v550_v42, %v549_v18  ;;  %v542_v26 = vadd.f32 %v541_v28, %v540_v56  ;;  %v536_v54 = vrot.slane %v535_v0, 2  ;;  %v2196_v60 = vpop.eup %1540  ;;  %vm315_vm15 = vmor %vm313_vm12, %vm314_vm13 }
  0x99   :  { %v291_v29 = vsub.f32 1.5, %v290_v50  ;;  %v281_v18 = vsub.f32 1.5, %v280_v24  ;;  %v298_v28 = vmul.f32 %v2183_v63, %v2142_v17  ;;  %v309_v52 = vmul.f32 %v2171_v38, %v308_v20 }
  0x9a   :  { %v543_v15 = vrot.slane %v542_v26, 4  ;;  %v552_v56 = vrot.slane %v551_v30, 4  ;;  %v318_v43 = vmul.f32 %v2196_v60, %v2157_v23  ;;  %v272_v20 = vmul.f32 %v2097_v34, %v271_v25 }
  0x9b   :  { %v2192_v1 = vpop.permute.xlu2 %621  ;;  %v292_v24 = vmul.f32 %v2125_v36, %v291_v29  ;;  %v299_v40 = vmul.f32 %v2183_v63, %v298_v28  ;;  %vm304_vm14 = vweird.f32 %v2183_v63  ;;  %vm324_vm2 = vweird.f32 %v2196_v60 }
  0x9c   :  { %v475_v42 = vpop.permute.xlu1 %474  ;;  %v544_v46 = vadd.f32 %v543_v15, %v542_v26  ;;  %v470_v16 = vpop.permute.xlu0 %469  ;;  %v537_v26 = vadd.f32 %v536_v54, %v535_v0  ;;  %v553_v15 = vadd.f32 %v552_v56, %v551_v30  ;;  %v501_v0 = vmul.f32 %v2105_v47, %v2058_v33  ;;  %vm305_vm0 = vmor %vm303_vm11, %vm304_vm14 }
  0x9d   :  { %v500_v53 = vmul.f32 %v475_v42, %v2018_v61  ;;  %v499_v21 = vmul.f32 %v470_v16, %v2023_v49  ;;  %v282_v30 = vmul.f32 %v2131_v58, %v281_v18  ;;  %v576_v54 = vmul.f32 %v512_v57, %v2186_v3  ;;  %vm325_vm3 = vmor %vm323_vm1, %vm324_vm2 }
  0x9e   :  { %v545_v4 = vrot.slane %v544_v46, 2  ;;  %v538_v31 = vrot.slane %v537_v26, 1  ;;  %v554_v29 = vrot.slane %v553_v15, 2  ;;  %v2243_v57 = vsel %vm2212_vm7, %v2125_v36, %v292_v24 }
  0x9f   :  { %v559_v50 = vsel %vm503_vm10, %v500_v53, 0.0  ;;  %v558_v42 = vsel %vm503_vm10, %v499_v21, 0.0  ;;  %v310_v53 = vmul.f32 0.5, %v309_v52  ;;  %v319_v48 = vmul.f32 %v2196_v60, %v318_v43 }
  0xa0   :  { %v546_v16 = vadd.f32 %v545_v4, %v544_v46  ;;  %v560_v62 = vadd.f32 %v559_v50, %v558_v42  ;;  %v529_v4 = vrot.slane %v528_v39, 1  ;;  %v300_v42 = vmul.f32 0.5, %v299_v40 }
  0xa1   :  { %v2254_v2 = vsel %vm2222_vm8, %v2097_v34, %v272_v20  ;;  %v2259_v43 = vsel %vm2232_vm9, %v2131_v58, %v282_v30  ;;  %v567_v59 = vsel %vm503_vm10, %v501_v0, 0.0  ;;  %v539_v36 = vadd.f32 %v538_v31, %v537_v26  ;;  %v2283_v31 = vld [vmem:[%s2670_s0 + $0x20] sm:$0xff] }
  0xa2   :  { %v561_v25 = vrot.slane %v560_v62, 4  ;;  %v547_v56 = vrot.slane %v546_v16, 1  ;;  %v530_v9 = vadd.f32 %v529_v4, %v528_v39  ;;  %v555_v40 = vadd.f32 %v554_v29, %v553_v15  ;;  %898 = vperm.xlu2 %1497, %v2283_v31  }
  0xa3   :  { %v301_v34 = vsub.f32 1.5, %v300_v42  ;;  %v579_v26 = vmul.f32 %v539_v36, %v2259_v43  ;;  %vm1380_vm7 = vcmask 1041409   ;;  %vm1383_vm8 = vcmask 1042434  }
  0xa4   :  { %v587_v46 = vpop.permute.xlu1 %586  ;;  %v562_v18 = vadd.f32 %v561_v25, %v560_v62  ;;  %v485_v28 = vpop.permute.xlu0 %484  ;;  %v548_v44 = vadd.f32 %v547_v56, %v546_v16  ;;  %v311_v25 = vsub.f32 1.5, %v310_v53  ;;  %v578_v0 = vmul.f32 %v530_v9, %v2254_v2 }
  0xa5   :  { %v2246_v21 = vmul.f32 %v587_v46, %v576_v54  ;;  %v2248_v50 = vpop.permute.xlu2 %649  ;;  %v502_v52 = vmul.f32 %v485_v28, %v2063_v37  ;;  %v320_v54 = vmul.f32 0.5, %v319_v48  ;;  %v556_v30 = vrot.slane %v555_v40, 1 }
  0xa6   :  { %v563_v62 = vrot.slane %v562_v18, 2  ;;  %v580_v24 = vmul.f32 %v548_v44, %v2243_v57  ;;  %v312_v47 = vmul.f32 %v2171_v38, %v311_v25  ;;  %v302_v48 = vmul.f32 %v2183_v63, %v301_v34 }
  0xa7   :  { %v568_v16 = vsel %vm503_vm10, %v502_v52, 0.0  ;;  %v321_v44 = vsub.f32 1.5, %v320_v54  ;;  %v557_v52 = vadd.f32 %v556_v30, %v555_v40  ;;  %vm1386_vm9 = vcmask 1043459  }
  0xa8   :  { %v569_v27 = vadd.f32 %v568_v16, %v567_v59  ;;  %v564_v20 = vadd.f32 %v563_v62, %v562_v18  ;;  %v2265_v39 = vmul.f32 %v2159_v55, %v580_v24  ;;  %v2277_v55 = vld [vmem:[%s2670_s0 + $0x18] sm:$0xff]  ;;  %v2302_v9 = vsel %vm315_vm15, %v2171_v38, %v312_v47 }
  0xa9   :  { %894 = vperm.xlu1 %1496, %v2277_v55   ;;  %v322_v45 = vmul.f32 %v2196_v60, %v321_v44  ;;  %v2306_v62 = vsel %vm305_vm0, %v2183_v63, %v302_v48  ;;  %v706_v44 = vmul.f32 %v2248_v50, %v1928_v5  ;;  %vm1389_vm11 = vcmask 1044484  }
  0xaa   :  { %v570_v58 = vrot.slane %v569_v27, 4  ;;  %v565_v15 = vrot.slane %v564_v20, 1  ;;  %v581_v23 = vmul.f32 %v557_v52, %v2306_v62  ;;  %vm1392_vm12 = vcmask 1045509  }
  0xab   :  { %v2311_v16 = vsel %vm325_vm3, %v2196_v60, %v322_v45  ;;  %vm1395_vm13 = vcmask 1046534   ;;  %vm1398_vm14 = vcmask 1047559  }
  0xac   :  { %v602_v4 = vpop.permute.xlu1 %601  ;;  %v571_v56 = vadd.f32 %v570_v58, %v569_v27  ;;  %v597_v29 = vpop.permute.xlu0 %596  ;;  %v566_v42 = vadd.f32 %v565_v15, %v564_v20 }
  0xad   :  { %v2286_v46 = vmul.f32 %v602_v4, %v579_v26  ;;  %v658_v53 = vpop.permute.xlu2 %657  ;;  %v2293_v18 = vmul.f32 %v597_v29, %v578_v0 }
  0xae   :  { %v572_v28 = vrot.slane %v571_v56, 2  ;;  %v582_v17 = vmul.f32 %v566_v42, %v2302_v9 }
  0xb0   :  { %v573_v59 = vadd.f32 %v572_v28, %v571_v56 }
  0xb2   :  { %v574_v36 = vrot.slane %v573_v59, 1 }
  0xb4   :  { %v617_v24 = vpop.permute.xlu1 %616  ;;  %v612_v40 = vpop.permute.xlu0 %611  ;;  %v575_v54 = vadd.f32 %v574_v36, %v573_v59 }
  0xb5   :  { %v2313_v25 = vmul.f32 %v617_v24, %v582_v17  ;;  %v670_v38 = vpop.permute.xlu2 %669  ;;  %v2315_v27 = vmul.f32 %v612_v40, %v581_v23  ;;  %v708_v17 = vmul.f32 %v658_v53, %v1954_v7 }
  0xb6   :  { %v583_v63 = vmul.f32 %v575_v54, %v2311_v16  ;;  %v711_v50 = vmul.f32 %v670_v38, %v1981_v14 }
  0xb8   :  { %v2319_v34 = vmul.f32 %v2192_v1, %v583_v63 }
  0xbd   :  { %v682_v20 = vpop.permute.xlu2 %681  ;;  %v642_v58 = vpop.permute.xlu0 %641 }
  0xbe   :  { %v646_v26 = vpop.permute.xlu1 %645  ;;  %v704_v15 = vmul.f32 %v642_v58, %v1944_v10  ;;  %v730_v10 = vsel %vm720_vm4, %v706_v44, 0.0  ;;  %v739_v58 = vsel %vm720_vm4, %v708_v17, 0.0 }
  0xbf   :  { %v705_v60 = vmul.f32 %v646_v26, %v1949_v11 }
  0xc0   :  { %v721_v0 = vsel %vm720_vm4, %v704_v15, 0.0 }
  0xc1   :  { %v722_v4 = vsel %vm720_vm4, %v705_v60, 0.0  ;;  %v749_v60 = vsel %vm720_vm4, %v711_v50, 0.0 }
  0xc2   :  { %v723_v30 = vadd.f32 %v722_v4, %v721_v0  ;;  %v714_v4 = vmul.f32 %v682_v20, %v2032_v12 }
  0xc4   :  { %v724_v47 = vrot.slane %v723_v30, 4 }
  0xc5   :  { %v662_v1 = vpop.permute.xlu0 %661  ;;  %v694_v48 = vpop.permute.xlu2 %693 }
  0xc6   :  { %v725_v56 = vadd.f32 %v724_v47, %v723_v30  ;;  %v654_v29 = vpop.permute.xlu1 %653  ;;  %v709_v11 = vmul.f32 %v662_v1, %v1959_v8 }
  0xc7   :  { %v707_v28 = vmul.f32 %v654_v29, %v1933_v6 }
  0xc8   :  { %v726_v42 = vrot.slane %v725_v56, 2  ;;  %v740_v23 = vsel %vm720_vm4, %v709_v11, 0.0 }
  0xc9   :  { %v731_v52 = vsel %vm720_vm4, %v707_v28, 0.0  ;;  %v741_v8 = vadd.f32 %v740_v23, %v739_v58 }
  0xca   :  { %v732_v45 = vadd.f32 %v731_v52, %v730_v10  ;;  %v727_v59 = vadd.f32 %v726_v42, %v725_v56  ;;  %v766_v10 = vsel %vm720_vm4, %v714_v4, 0.0 }
  0xcb   :  { %v742_v30 = vrot.slane %v741_v8, 4 }
  0xcc   :  { %v728_v36 = vrot.slane %v727_v59, 1  ;;  %v733_v24 = vrot.slane %v732_v45, 4 }
  0xcd   :  { %v674_v40 = vpop.permute.xlu0 %673  ;;  %v803_v7 = vpop.permute.xlu2 %802  ;;  %v743_v11 = vadd.f32 %v742_v30, %v741_v8 }
  0xce   :  { %v729_v54 = vadd.f32 %v728_v36, %v727_v59  ;;  %v666_v63 = vpop.permute.xlu1 %665  ;;  %v734_v0 = vadd.f32 %v733_v24, %v732_v45 }
  0xcf   :  { %v710_v26 = vmul.f32 %v666_v63, %v1986_v13  ;;  %v712_v13 = vmul.f32 %v674_v40, %v1992_v19  ;;  %v744_v50 = vrot.slane %v743_v11, 2 }
  0xd0   :  { %v793_v15 = vmul.f32 %v729_v54, %v2186_v3  ;;  %v735_v44 = vrot.slane %v734_v0, 2  ;;  %v1659_v54 = vmov 3  }
  0xd1   :  { %v748_v53 = vsel %vm720_vm4, %v710_v26, 0.0  ;;  %v757_v12 = vsel %vm720_vm4, %v712_v13, 0.0  ;;  %1499 = vset.pattern.permute.xlu0 %v1659_v54 }
  0xd2   :  { %v833_v14 = vmul.f32 %v803_v7, %v793_v15  ;;  %v750_v38 = vadd.f32 %v749_v60, %v748_v53  ;;  %v736_v59 = vadd.f32 %v735_v44, %v734_v0  ;;  %v745_v7 = vadd.f32 %v744_v50, %v743_v11 }
  0xd4   :  { %v751_v47 = vrot.slane %v750_v38, 4  ;;  %849 = vrot.lane.b32.xlu1 %v833_v14, %s1658_s15  ;;  %v737_v40 = vrot.slane %v736_v59, 1  ;;  %v746_v13 = vrot.slane %v745_v7, 1 }
  0xd5   :  { %v686_v1 = vpop.permute.xlu0 %685 }
  0xd6   :  { %v752_v56 = vadd.f32 %v751_v47, %v750_v38  ;;  %v678_v29 = vpop.permute.xlu1 %677  ;;  %v715_v28 = vmul.f32 %v686_v1, %v2044_v22  ;;  %v717_v22 = vmul.f32 %v694_v48, %v2018_v61  ;;  %v815_v38 = vpop.permute.xlu2 %814  ;;  %v738_v48 = vadd.f32 %v737_v40, %v736_v59 }
  0xd7   :  { %v713_v42 = vmul.f32 %v678_v29, %v1997_v32 }
  0xd8   :  { %v753_v52 = vrot.slane %v752_v56, 2  ;;  %v767_v20 = vsel %vm720_vm4, %v715_v28, 0.0  ;;  %v776_v53 = vsel %vm720_vm4, %v717_v22, 0.0  ;;  %v794_v1 = vmul.f32 %v738_v48, %v2155_v51 }
  0xd9   :  { %v758_v45 = vsel %vm720_vm4, %v713_v42, 0.0  ;;  %v768_v17 = vadd.f32 %v767_v20, %v766_v10  ;;  %v747_v20 = vadd.f32 %v746_v13, %v745_v7 }
  0xda   :  { %v754_v19 = vadd.f32 %v753_v52, %v752_v56  ;;  %v759_v36 = vadd.f32 %v758_v45, %v757_v12 }
  0xdb   :  { %v769_v32 = vrot.slane %v768_v17, 4  ;;  %v795_v22 = vmul.f32 %v747_v20, %v2254_v2 }
  0xdc   :  { %v755_v23 = vrot.slane %v754_v19, 1  ;;  %v760_v24 = vrot.slane %v759_v36, 4 }
  0xdd   :  { %v698_v26 = vpop.permute.xlu0 %697  ;;  %v770_v14 = vadd.f32 %v769_v32, %v768_v17 }
  0xde   :  { %v756_v63 = vadd.f32 %v755_v23, %v754_v19  ;;  %v761_v58 = vadd.f32 %v760_v24, %v759_v36  ;;  %v690_v8 = vpop.permute.xlu1 %689 }
  0xdf   :  { %v716_v15 = vmul.f32 %v690_v8, %v2023_v49  ;;  %v771_v56 = vrot.slane %v770_v14, 2  ;;  %v718_v49 = vmul.f32 %v698_v26, %v2058_v33 }
  0xe0   :  { %v796_v60 = vmul.f32 %v756_v63, %v2259_v43  ;;  %v762_v0 = vrot.slane %v761_v58, 2 }
  0xe1   :  { %v775_v61 = vsel %vm720_vm4, %v716_v15, 0.0  ;;  %v784_v45 = vsel %vm720_vm4, %v718_v49, 0.0  ;;  %v772_v19 = vadd.f32 %v771_v56, %v770_v14  ;;  %v1544_v56 = vld [vmem:[%s2670_s0 + $0x30] sm:$0xff]  ;;  %v1545_v49 = vld [vmem:[%s2670_s0 + $0x48] sm:$0xff] }
  0xe2   :  { %v836_v4 = vmul.f32 %v815_v38, %v796_v60  ;;  %v777_v30 = vadd.f32 %v776_v53, %v775_v61  ;;  %v763_v47 = vadd.f32 %v762_v0, %v761_v58  ;;  %v827_v0 = vpop.permute.xlu2 %826 }
  0xe3   :  { %v773_v32 = vrot.slane %v772_v19, 1 }
  0xe4   :  { %v778_v44 = vrot.slane %v777_v30, 4  ;;  %855 = vrot.lane.b32.xlu1 %v836_v4, %s1658_s15  ;;  %v764_v29 = vrot.slane %v763_v47, 1 }
  0xe5   :  { %v807_v42 = vpop.permute.xlu0 %806  ;;  %v774_v7 = vadd.f32 %v773_v32, %v772_v19  ;;  %v1552_v19 = vld [vmem:[%s2670_s0] sm:$0xff]  ;;  %v1557_v32 = vld [vmem:[%s2670_s0 + $0x70] sm:$0xff] }
  0xe6   :  { %v779_v28 = vadd.f32 %v778_v44, %v777_v30  ;;  %v702_v10 = vpop.permute.xlu1 %701  ;;  %v834_v11 = vmul.f32 %v807_v42, %v794_v1  ;;  %v765_v17 = vadd.f32 %v764_v29, %v763_v47  ;;  %v1546_v1 = vld [vmem:[%s2670_s0 + $0x38] sm:$0xff]  ;;  %v1547_v29 = vld [vmem:[%s2670_s0 + $0x60] sm:$0xff]  ;;  %v1550_v42 = vld [vmem:[%s2670_s0 + $0x68] sm:$0xff] }
  0xe7   :  { %v719_v52 = vmul.f32 %v702_v10, %v2063_v37  ;;  %v798_v61 = vmul.f32 %v774_v7, %v2306_v62  ;;  %v2710_v7 = vld [vmem:[#allocation17_spill] sm:$0xff] }
  0xe8   :  { %v780_v12 = vrot.slane %v779_v28, 2  ;;  %851 = vrot.lane.b32.xlu2 %v834_v11, %s1658_s15  ;;  %v797_v24 = vmul.f32 %v765_v17, %v2243_v57 }
  0xe9   :  { %v785_v59 = vsel %vm720_vm4, %v719_v52, 0.0 }
  0xea   :  { %v781_v33 = vadd.f32 %v780_v12, %v779_v28  ;;  %v786_v36 = vadd.f32 %v785_v59, %v784_v45  ;;  %v1549_v28 = vld [vmem:[%s2670_s0 + $0x78] sm:$0xff]  ;;  %v891_v11 = vpop.permute.xlu2 %890  ;;  %v1551_v12 = vld [vmem:[%s2670_s0 + $0x10] sm:$0xff] }
  0xeb   :  { %v947_v52 = vmul.f32 %v891_v11, %v1928_v5 }
  0xec   :  { %v782_v50 = vrot.slane %v781_v33, 1  ;;  %v787_v23 = vrot.slane %v786_v36, 4 }
  0xed   :  { %v819_v40 = vpop.permute.xlu0 %818  ;;  %v971_v45 = vsel %vm961_vm5, %v947_v52, 0.0 }
  0xee   :  { %v788_v37 = vadd.f32 %v787_v23, %v786_v36  ;;  %v811_v63 = vpop.permute.xlu1 %810  ;;  %v783_v58 = vadd.f32 %v782_v50, %v781_v33  ;;  %v837_v26 = vmul.f32 %v819_v40, %v797_v24  ;;  %v2705_v33 = vmov 2   ;;  %v1555_v36 = vld [vmem:[%s2670_s0 + $0x40] sm:$0xff]  ;;  %v1556_v23 = vld [vmem:[%s2670_s0 + $0x58] sm:$0xff] }
  0xef   :  { %v835_v8 = vmul.f32 %v811_v63, %v795_v22 }
  0xf0   :  { %v789_v15 = vrot.slane %v788_v37, 2  ;;  %v799_v60 = vmul.f32 %v783_v58, %v2302_v9  ;;  %857 = vrot.lane.b32.xlu2 %v837_v26, %s1658_s15  ;;  %v2707_v26 = vld [vmem:[#allocation14_spill] sm:$0xff] }
  0xf1   :  { %853 = vrot.lane.b32.xlu0 %v835_v8, %s1658_s15  ;;  %v2708_v8 = vld [vmem:[#allocation11_spill] sm:$0xff] }
  0xf2   :  { %v839_v53 = vmul.f32 %v827_v0, %v799_v60  ;;  %v790_v14 = vadd.f32 %v789_v15, %v788_v37  ;;  %v2709_v15 = vld [vmem:[#allocation12_spill] sm:$0xff] }
  0xf4   :  { %861 = vrot.lane.b32.xlu1 %v839_v53, %s1658_s15  ;;  %v791_v38 = vrot.slane %v790_v14, 1 }
  0xf5   :  { %v831_v44 = vpop.permute.xlu0 %830 }
  0xf6   :  { %v792_v48 = vadd.f32 %v791_v38, %v790_v14  ;;  %v823_v4 = vpop.permute.xlu1 %822  ;;  %v2711_v14 = vld [vmem:[#allocation16_spill] sm:$0xff] }
  0xf7   :  { %v838_v30 = vmul.f32 %v823_v4, %v798_v61 }
  0xf8   :  { %v800_v47 = vmul.f32 %v792_v48, %v2311_v16 }
  0xf9   :  { %859 = vrot.lane.b32.xlu0 %v838_v30, %s1658_s15 }
  0xfa   :  { %v840_v13 = vmul.f32 %v831_v44, %v800_v47 }
  0xfc   :  { %906 = vperm.xlu1 %1496, %v1544_v56   ;;  %863 = vrot.lane.b32.xlu2 %v840_v13, %s1658_s15  ;;  %v2420_v50 = vpop.permute.xlu2 %898 }
  0xff   :  { %v2393_v10 = vpop.permute.xlu1 %886 }
 0x101   :  { %1135 = vperm.xlu0 %1499, %v2277_v55   ;;  %v1548_v55 = vld [vmem:[%s2670_s0 + $0x50] sm:$0xff] }
 0x104   :  { %918 = vperm.xlu1 %1496, %v1545_v49   ;;  %910 = vperm.xlu2 %1497, %v1546_v1  }
 0x109   :  { %1147 = vperm.xlu0 %1499, %v1544_v56  }
 0x10c   :  { %930 = vperm.xlu1 %1496, %v1547_v29   ;;  %922 = vperm.xlu2 %1497, %v1548_v55  }
 0x111   :  { %1159 = vperm.xlu0 %1499, %v1545_v49  }
 0x114   :  { %942 = vperm.xlu1 %1496, %v1549_v28   ;;  %934 = vperm.xlu2 %1497, %v1550_v42  }
 0x119   :  { %1171 = vperm.xlu0 %1499, %v1547_v29   ;;  %v2490_v29 = vld [vmem:[%s2671_s1 + $0x60] sm:$0xff] }
 0x11b   :  { %v895_v20 = vpop.permute.xlu1 %894 }
 0x11c   :  { %1500 = vset.pattern.permute.xlu1 %v1659_v54  ;;  %1498 = vset.pattern.permute.xlu2 %v1659_v54  ;;  %v948_v59 = vmul.f32 %v895_v20, %v1933_v6  ;;  %v1554_v6 = vld [vmem:[%s2670_s0 + $0x8] sm:$0xff] }
 0x11d   :  { %1139 = vperm.xlu1 %1500, %v2283_v31   ;;  %1131 = vperm.xlu2 %1498, %v1551_v12   ;;  %v1553_v31 = vld [vmem:[%s2670_s0 + $0x28] sm:$0xff] }
 0x11e   :  { %v972_v5 = vsel %vm961_vm5, %v948_v59, 0.0  ;;  %v2508_v59 = vld [vmem:[%s2671_s1 + $0x30] sm:$0xff] }
 0x11f   :  { %v2405_v17 = vadd.f32 %v972_v5, %v971_v45 }
 0x121   :  { %1183 = vperm.xlu0 %1499, %v1549_v28  }
 0x125   :  { %1123 = vperm.xlu1 %1500, %v1552_v19   ;;  %1143 = vperm.xlu2 %1498, %v1553_v31  }
 0x129   :  { %1501 = vset.pattern.permute.xlu0 %v2705_v33 }
 0x12a   :  { %882 = vperm.xlu0 %1501, %v1552_v19  }
 0x12d   :  { %1151 = vperm.xlu1 %1500, %v1546_v1   ;;  %1127 = vperm.xlu2 %1498, %v1554_v6  }
 0x132   :  { %902 = vperm.xlu0 %1501, %v1553_v31   ;;  %v1561_v31 = vld [vmem:[%s2671_s1 + $0x38] sm:$0xff] }
 0x135   :  { %1163 = vperm.xlu1 %1500, %v1548_v55   ;;  %1155 = vperm.xlu2 %1498, %v1555_v36  }
 0x13a   :  { %914 = vperm.xlu0 %1501, %v1555_v36  }
 0x13d   :  { %1175 = vperm.xlu1 %1500, %v1550_v42   ;;  %1167 = vperm.xlu2 %1498, %v1556_v23  }
 0x142   :  { %926 = vperm.xlu0 %1501, %v1556_v23   ;;  %v852_v24 = vpop.permute.xlu2 %851 }
 0x143   :  { %v2426_v22 = vadd.f32 %v852_v24, %v2179_v41  ;;  %v2706_v41 = vld [vmem:[#allocation13_spill] sm:$0xff] }
 0x145   :  { %1502 = vset.pattern.permute.xlu1 %v2705_v33  ;;  %1179 = vperm.xlu2 %1498, %v1557_v32  }
 0x146   :  { %1047 = vperm.xlu1 %1502, %v1875_v35   ;;  %v850_v37 = vpop.permute.xlu1 %849 }
 0x147   :  { %v2434_v40 = vadd.f32 %v850_v37, %v2246_v21 }
 0x14a   :  { %938 = vperm.xlu0 %1501, %v1557_v32   ;;  %v858_v63 = vpop.permute.xlu2 %857 }
 0x14b   :  { %v2437_v58 = vadd.f32 %v858_v63, %v2265_v39  ;;  %v974_v63 = vrot.slane %v2405_v17, 4 }
 0x14d   :  { %1503 = vset.pattern.permute.xlu2 %v2705_v33 }
 0x14e   :  { %1055 = vperm.xlu1 %1502, %v2706_v41   ;;  %1051 = vperm.xlu2 %1503, %v2707_v26  }
 0x152   :  { %1043 = vperm.xlu0 %1501, %v2708_v8  }
 0x156   :  { %1059 = vperm.xlu1 %1502, %v2709_v15   ;;  %1504 = vset.pattern.permute.xlu2 %v1659_v54  ;;  %v864_v60 = vpop.permute.xlu2 %863  ;;  %v856_v21 = vpop.permute.xlu1 %855 }
 0x157   :  { %v2446_v0 = vadd.f32 %v864_v60, %v2319_v34  ;;  %v2449_v39 = vadd.f32 %v856_v21, %v2286_v46  ;;  %1288 = vperm.xlu2 %1504, %v1875_v35  }
 0x15a   :  { %1063 = vperm.xlu0 %1501, %v2710_v7  }
 0x15e   :  { %1505 = vset.pattern.permute.xlu1 %v1659_v54  ;;  %v911_v53 = vpop.permute.xlu2 %910 }
 0x15f   :  { %1284 = vperm.xlu1 %1505, %v2708_v8   ;;  %1292 = vperm.xlu2 %1504, %v2707_v26  }
 0x162   :  { %1067 = vperm.xlu0 %1501, %v2711_v14  }
 0x163   :  { %v854_v38 = vpop.permute.xlu0 %853 }
 0x164   :  { %v2458_v34 = vadd.f32 %v854_v38, %v2293_v18 }
 0x166   :  { %v2460_v61 = vpop.permute.xlu2 %922  ;;  %v862_v46 = vpop.permute.xlu1 %861 }
 0x167   :  { %v2463_v35 = vadd.f32 %v862_v46, %v2313_v25  ;;  %1300 = vperm.xlu1 %1505, %v2709_v15   ;;  %1296 = vperm.xlu2 %1504, %v2706_v41   ;;  %v2712_v25 = vld [vmem:[#allocation15_spill] sm:$0xff]  ;;  %v1563_v15 = vld [vmem:[%s2671_s1 + $0x18] sm:$0xff] }
 0x168   :  { %v1562_v41 = vld [vmem:[%s2671_s1 + $0x10] sm:$0xff] }
 0x16a   :  { %1507 = vset.pattern.permute.xlu0 %v1659_v54 }
 0x16b   :  { %1304 = vperm.xlu0 %1507, %v2710_v7   ;;  %v860_v48 = vpop.permute.xlu0 %859 }
 0x16c   :  { %v2470_v4 = vadd.f32 %v860_v48, %v2315_v27  ;;  %v2484_v27 = vld [vmem:[%s2671_s1 + $0x68] sm:$0xff] }
 0x16e   :  { %v935_v18 = vpop.permute.xlu2 %934  ;;  %v907_v30 = vpop.permute.xlu1 %906 }
 0x16f   :  { %1308 = vperm.xlu1 %1505, %v2711_v14   ;;  %1506 = vset.pattern.permute.xlu2 %v2705_v33  ;;  %v958_v49 = vmul.f32 %v2484_v27, %v935_v18  ;;  %v951_v5 = vmul.f32 %v2508_v59, %v907_v30  ;;  %v952_v33 = vmul.f32 %v1561_v31, %v911_v53  ;;  %v1564_v30 = vld [vmem:[%s2671_s1] sm:$0xff] }
 0x170   :  { %1071 = vperm.xlu2 %1506, %v2712_v25   ;;  %v975_v53 = vadd.f32 %v974_v63, %v2405_v17 }
 0x171   :  { %v1017_v28 = vsel %vm961_vm5, %v958_v49, 0.0  ;;  %v989_v36 = vsel %vm961_vm5, %v951_v5, 0.0  ;;  %v990_v24 = vsel %vm961_vm5, %v952_v33, 0.0  ;;  %v1567_v5 = vld [vmem:[%s2671_s1 + $0x28] sm:$0xff] }
 0x172   :  { %v991_v32 = vadd.f32 %v990_v24, %v989_v36 }
 0x173   :  { %v1136_v47 = vpop.permute.xlu0 %1135 }
 0x174   :  { %v992_v8 = vrot.slane %v991_v32, 4  ;;  %v1189_v60 = vmul.f32 %v1563_v15, %v1136_v47  ;;  %v1565_v47 = vld [vmem:[%s2671_s1 + $0x8] sm:$0xff] }
 0x175   :  { %v946_v49 = vmul.f32 %v1565_v47, %v2393_v10 }
 0x176   :  { %v2475_v44 = vpop.permute.xlu1 %918  ;;  %v993_v38 = vadd.f32 %v992_v8, %v991_v32  ;;  %v1213_v46 = vsel %vm1202_vm6, %v1189_v60, 0.0 }
 0x177   :  { %v1132_v13 = vpop.permute.xlu2 %1131  ;;  %v963_v10 = vsel %vm961_vm5, %v946_v49, 0.0 }
 0x178   :  { %1508 = vset.pattern.permute.xlu2 %v1659_v54  ;;  %v1188_v26 = vmul.f32 %v1562_v41, %v1132_v13  ;;  %v976_v13 = vrot.slane %v975_v53, 2  ;;  %v994_v17 = vrot.slane %v993_v38, 2 }
 0x179   :  { %1312 = vperm.xlu2 %1508, %v2712_v25  }
 0x17a   :  { %v1212_v14 = vsel %vm1202_vm6, %v1188_v26, 0.0  ;;  %v977_v63 = vadd.f32 %v976_v13, %v975_v53 }
 0x17b   :  { %v2479_v56 = vpop.permute.xlu0 %1147  ;;  %v1214_v18 = vadd.f32 %v1213_v46, %v1212_v14 }
 0x17c   :  { %v978_v53 = vrot.slane %v977_v63, 1 }
 0x17e   :  { %v931_v1 = vpop.permute.xlu1 %930 }
 0x17f   :  { %v957_v55 = vmul.f32 %v2490_v29, %v931_v1  ;;  %v1144_v54 = vpop.permute.xlu2 %1143  ;;  %v1566_v1 = vld [vmem:[%s2671_s1 + $0x20] sm:$0xff] }
 0x180   :  { %v1191_v33 = vmul.f32 %v1567_v5, %v1144_v54 }
 0x181   :  { %v1016_v42 = vsel %vm961_vm5, %v957_v55, 0.0 }
 0x182   :  { %v2495_v11 = vadd.f32 %v1017_v28, %v1016_v42  ;;  %v949_v28 = vmul.f32 %v1566_v1, %v2420_v50  ;;  %v1215_v42 = vrot.slane %v1214_v18, 4 }
 0x183   :  { %v2497_v52 = vpop.permute.xlu0 %1159 }
 0x184   :  { %v980_v50 = vsel %vm961_vm5, %v949_v28, 0.0  ;;  %v1216_v54 = vadd.f32 %v1215_v42, %v1214_v18  ;;  %v1192_v18 = vmul.f32 %v2508_v59, %v2479_v56 }
 0x186   :  { %v2499_v12 = vpop.permute.xlu1 %942 }
 0x187   :  { %v2501_v20 = vpop.permute.xlu2 %1127 }
 0x18b   :  { %v2503_v45 = vpop.permute.xlu0 %1171 }
 0x18f   :  { %v1140_v19 = vpop.permute.xlu1 %1139  ;;  %v2514_v6 = vpop.permute.xlu2 %1155 }
 0x190   :  { %v1190_v55 = vmul.f32 %v1566_v1, %v1140_v19  ;;  %v995_v19 = vadd.f32 %v994_v17, %v993_v38 }
 0x192   :  { %v1221_v41 = vsel %vm1202_vm6, %v1190_v55, 0.0  ;;  %v996_v49 = vrot.slane %v995_v19, 1  ;;  %v1217_v55 = vrot.slane %v1216_v54, 2 }
 0x193   :  { %v2517_v23 = vpop.permute.xlu0 %1183 }
 0x197   :  { %v2520_v37 = vpop.permute.xlu1 %1123  ;;  %v2529_v21 = vpop.permute.xlu2 %1167 }
 0x198   :  { %v1186_v56 = vmul.f32 %v1564_v30, %v2520_v37 }
 0x19c   :  { %v883_v7 = vpop.permute.xlu0 %882 }
 0x19d   :  { %v945_v25 = vmul.f32 %v1564_v30, %v883_v7  ;;  %v1222_v7 = vsel %vm1202_vm6, %v1191_v33, 0.0  ;;  %v1569_v33 = vld [vmem:[%s2671_s1 + $0x40] sm:$0xff] }
 0x19e   :  { %v1223_v46 = vadd.f32 %v1222_v7, %v1221_v41  ;;  %v997_v41 = vadd.f32 %v996_v49, %v995_v19 }
 0x19f   :  { %v1152_v48 = vpop.permute.xlu1 %1151  ;;  %v962_v36 = vsel %vm961_vm5, %v945_v25, 0.0  ;;  %v2551_v26 = vpop.permute.xlu2 %1179  ;;  %v1568_v25 = vld [vmem:[%s2671_s1 + $0x48] sm:$0xff] }
 0x1a0   :  { %v964_v8 = vadd.f32 %v963_v10, %v962_v36  ;;  %v954_v13 = vmul.f32 %v1568_v25, %v2475_v44  ;;  %v1193_v1 = vmul.f32 %v1561_v31, %v1152_v48  ;;  %v1224_v42 = vrot.slane %v1223_v46, 4  ;;  %v1570_v44 = vld [vmem:[%s2671_s1 + $0x50] sm:$0xff] }
 0x1a1   :  { %v1195_v19 = vmul.f32 %v1568_v25, %v2497_v52  ;;  %v1571_v25 = vld [vmem:[%s2671_s1 + $0x58] sm:$0xff] }
 0x1a2   :  { %v965_v17 = vrot.slane %v964_v8, 4  ;;  %v999_v31 = vsel %vm961_vm5, %v954_v13, 0.0  ;;  %v1187_v13 = vmul.f32 %v1565_v47, %v2501_v20  ;;  %v1037_v20 = vmul.f32 %v997_v41, %v2259_v43 }
 0x1a3   :  { %v1194_v47 = vmul.f32 %v1569_v33, %v2514_v6 }
 0x1a4   :  { %v903_v24 = vpop.permute.xlu0 %902  ;;  %v966_v59 = vadd.f32 %v965_v17, %v964_v8  ;;  %v1203_v17 = vsel %vm1202_vm6, %v1186_v56, 0.0  ;;  %v1204_v52 = vsel %vm1202_vm6, %v1187_v13, 0.0 }
 0x1a5   :  { %v950_v32 = vmul.f32 %v1567_v5, %v903_v24  ;;  %v979_v24 = vadd.f32 %v978_v53, %v977_v63  ;;  %v1019_v63 = vrot.slane %v2495_v11, 4 }
 0x1a7   :  { %v981_v15 = vsel %vm961_vm5, %v950_v32, 0.0  ;;  %v2555_v60 = vpop.permute.xlu1 %1163  ;;  %v955_v32 = vmul.f32 %v1570_v44, %v2460_v61  ;;  %v1230_v61 = vsel %vm1202_vm6, %v1192_v18, 0.0  ;;  %v1035_v8 = vmul.f32 %v979_v24, %v2155_v51 }
 0x1a8   :  { %v982_v14 = vadd.f32 %v981_v15, %v980_v50  ;;  %v1052_v10 = vpop.permute.xlu2 %1051  ;;  %v1231_v50 = vsel %vm1202_vm6, %v1193_v1, 0.0  ;;  %v967_v1 = vrot.slane %v966_v59, 2  ;;  %v1240_v24 = vsel %vm1202_vm6, %v1195_v19, 0.0 }
 0x1a9   :  { %v1232_v37 = vadd.f32 %v1231_v50, %v1230_v61  ;;  %v1007_v49 = vsel %vm961_vm5, %v955_v32, 0.0  ;;  %v1205_v32 = vadd.f32 %v1204_v52, %v1203_v17  ;;  %v1196_v50 = vmul.f32 %v1570_v44, %v2555_v60 }
 0x1aa   :  { %v983_v38 = vrot.slane %v982_v14, 4  ;;  %v1239_v19 = vsel %vm1202_vm6, %v1194_v47, 0.0 }
 0x1ac   :  { %v984_v28 = vadd.f32 %v983_v38, %v982_v14  ;;  %v915_v5 = vpop.permute.xlu0 %914  ;;  %v1218_v38 = vadd.f32 %v1217_v55, %v1216_v54 }
 0x1ad   :  { %v953_v36 = vmul.f32 %v1569_v33, %v915_v5  ;;  %v1225_v5 = vadd.f32 %v1224_v42, %v1223_v46  ;;  %v968_v33 = vadd.f32 %v967_v1, %v966_v59 }
 0x1ae   :  { %v985_v48 = vrot.slane %v984_v28, 2  ;;  %v1219_v55 = vrot.slane %v1218_v38, 1 }
 0x1af   :  { %v998_v15 = vsel %vm961_vm5, %v953_v36, 0.0  ;;  %v2575_v7 = vpop.permute.xlu1 %1175  ;;  %v1226_v46 = vrot.slane %v1225_v5, 2 }
 0x1b0   :  { %v986_v14 = vadd.f32 %v985_v48, %v984_v28  ;;  %v1000_v53 = vadd.f32 %v999_v31, %v998_v15  ;;  %v2585_v28 = vadd.f32 %v1019_v63, %v2495_v11  ;;  %v1233_v11 = vrot.slane %v1232_v37, 4  ;;  %v1572_v48 = vld [vmem:[%s2671_s1 + $0x78] sm:$0xff] }
 0x1b1   :  { %v960_v41 = vmul.f32 %v1572_v48, %v2499_v12  ;;  %v1289_v63 = vpop.permute.xlu2 %1288  ;;  %v1573_v12 = vld [vmem:[%s2671_s1 + $0x70] sm:$0xff]  ;;  %s1661_s1 = smov 104  }
 0x1b2   :  { %v987_v30 = vrot.slane %v986_v14, 1  ;;  %v1001_v36 = vrot.slane %v1000_v53, 4  ;;  %v1200_v59 = vmul.f32 %v1573_v12, %v2551_v26  ;;  %v1021_v44 = vrot.slane %v2585_v28, 2 }
 0x1b4   :  { %v988_v54 = vadd.f32 %v987_v30, %v986_v14  ;;  %v927_v18 = vpop.permute.xlu0 %926  ;;  %v1002_v56 = vadd.f32 %v1001_v36, %v1000_v53  ;;  %v1220_v14 = vadd.f32 %v1219_v55, %v1218_v38  ;;  %v1197_v30 = vmul.f32 %v1571_v25, %v2529_v21 }
 0x1b5   :  { %v956_v42 = vmul.f32 %v1571_v25, %v927_v18  ;;  %v1206_v18 = vrot.slane %v1205_v32, 4  ;;  %v1234_v53 = vadd.f32 %v1233_v11, %v1232_v37  ;;  %v969_v21 = vrot.slane %v968_v33, 1 }
 0x1b6   :  { %v1036_v31 = vmul.f32 %v988_v54, %v2254_v2  ;;  %v1227_v54 = vadd.f32 %v1226_v46, %v1225_v5  ;;  %v1003_v38 = vrot.slane %v1002_v56, 2  ;;  %v1241_v5 = vadd.f32 %v1240_v24, %v1239_v19 }
 0x1b7   :  { %v1008_v6 = vsel %vm961_vm5, %v956_v42, 0.0  ;;  %v1201_v37 = vmul.f32 %v1572_v48, %v2517_v23  ;;  %v1249_v36 = vsel %vm1202_vm6, %v1197_v30, 0.0  ;;  %v1207_v47 = vadd.f32 %v1206_v18, %v1205_v32 }
 0x1b8   :  { %v1076_v15 = vmul.f32 %v1052_v10, %v1036_v31  ;;  %v1009_v61 = vadd.f32 %v1008_v6, %v1007_v49  ;;  %v1048_v13 = vpop.permute.xlu1 %1047  ;;  %v1026_v10 = vsel %vm961_vm5, %v960_v41, 0.0  ;;  %v1276_v49 = vmul.f32 %v1220_v14, %v2155_v51 }
 0x1b9   :  { %v1075_v17 = vmul.f32 %v1048_v13, %v1035_v8  ;;  %v1248_v8 = vsel %vm1202_vm6, %v1196_v50, 0.0  ;;  %v1228_v55 = vrot.slane %v1227_v54, 1  ;;  %v1266_v46 = vsel %vm1202_vm6, %v1200_v59, 0.0  ;;  %v1293_v30 = vpop.permute.xlu2 %1292 }
 0x1ba   :  { %v1010_v60 = vrot.slane %v1009_v61, 4  ;;  %1094 = vrot.lane.b32.xlu2 %v1076_v15, %s1660_s22  ;;  %v1235_v25 = vrot.slane %v1234_v53, 2  ;;  %v1250_v11 = vadd.f32 %v1249_v36, %v1248_v8  ;;  %v970_v31 = vadd.f32 %v969_v21, %v968_v33 }
 0x1bb   :  { %1092 = vrot.lane.b32.xlu1 %v1075_v17, %s1660_s22  ;;  %v1004_v41 = vadd.f32 %v1003_v38, %v1002_v56  ;;  %v1199_v51 = vmul.f32 %v2484_v27, %v2575_v7  ;;  %v1316_v6 = vmul.f32 %v1289_v63, %v1276_v49  ;;  %v1198_v15 = vmul.f32 %v2490_v29, %v2503_v45 }
 0x1bc   :  { %v1011_v1 = vadd.f32 %v1010_v60, %v1009_v61  ;;  %v939_v26 = vpop.permute.xlu0 %938  ;;  %v1242_v32 = vrot.slane %v1241_v5, 4  ;;  %v1267_v14 = vsel %vm1202_vm6, %v1201_v37, 0.0  ;;  %v1208_v13 = vrot.slane %v1207_v47, 2 }
 0x1bd   :  { %v959_v52 = vmul.f32 %v1573_v12, %v939_v26  ;;  %v1268_v19 = vadd.f32 %v1267_v14, %v1266_v46  ;;  %v1229_v17 = vadd.f32 %v1228_v55, %v1227_v54  ;;  %v1236_v27 = vadd.f32 %v1235_v25, %v1234_v53 }
 0x1be   :  { %v1012_v42 = vrot.slane %v1011_v1, 2  ;;  %v1034_v7 = vmul.f32 %v970_v31, %v2186_v3  ;;  %v1005_v56 = vrot.slane %v1004_v41, 1  ;;  %v1251_v29 = vrot.slane %v1250_v11, 4 }
 0x1bf   :  { %v1025_v24 = vsel %vm961_vm5, %v959_v52, 0.0  ;;  %v1258_v45 = vsel %vm1202_vm6, %v1199_v51, 0.0  ;;  %v1257_v12 = vsel %vm1202_vm6, %v1198_v15, 0.0  ;;  %v1243_v59 = vadd.f32 %v1242_v32, %v1241_v5 }
 0x1c0   :  { %v1027_v50 = vadd.f32 %v1026_v10, %v1025_v24  ;;  %v1056_v23 = vpop.permute.xlu1 %1055  ;;  %v1013_v48 = vadd.f32 %v1012_v42, %v1011_v1  ;;  %v1022_v60 = vadd.f32 %v1021_v44, %v2585_v28  ;;  %v1269_v10 = vrot.slane %v1268_v19, 4 }
 0x1c1   :  { %v1077_v61 = vmul.f32 %v1056_v23, %v1037_v20  ;;  %v1277_v53 = vmul.f32 %v1229_v17, %v2254_v2  ;;  %v1209_v21 = vadd.f32 %v1208_v13, %v1207_v47  ;;  %v1259_v8 = vadd.f32 %v1258_v45, %v1257_v12  ;;  %v1297_v31 = vpop.permute.xlu2 %1296 }
 0x1c2   :  { %v1028_v33 = vrot.slane %v1027_v50, 4  ;;  %1333 = vrot.lane.b32.xlu2 %v1316_v6, %s1661_s1  ;;  %v1014_v63 = vrot.slane %v1013_v48, 1  ;;  %v1237_v49 = vrot.slane %v1236_v27, 1  ;;  %v1006_v1 = vadd.f32 %v1005_v56, %v1004_v41 }
 0x1c3   :  { %1096 = vrot.lane.b32.xlu1 %v1077_v61, %s1660_s22  ;;  %v1252_v37 = vadd.f32 %v1251_v29, %v1250_v11  ;;  %v1317_v55 = vmul.f32 %v1293_v30, %v1277_v53  ;;  %v1244_v46 = vrot.slane %v1243_v59, 2  ;;  %v1270_v5 = vadd.f32 %v1269_v10, %v1268_v19 }
 0x1c4   :  { %v1029_v18 = vadd.f32 %v1028_v33, %v1027_v50  ;;  %v1044_v20 = vpop.permute.xlu0 %1043  ;;  %v1015_v26 = vadd.f32 %v1014_v63, %v1013_v48  ;;  %v1210_v25 = vrot.slane %v1209_v21, 1  ;;  %v1023_v42 = vrot.slane %v1022_v60, 1 }
 0x1c5   :  { %v1074_v54 = vmul.f32 %v1044_v20, %v1034_v7  ;;  %v1260_v28 = vrot.slane %v1259_v8, 4  ;;  %v1238_v44 = vadd.f32 %v1237_v49, %v1236_v27  ;;  %v1038_v2 = vmul.f32 %v1006_v1, %v2243_v57 }
 0x1c6   :  { %v1030_v38 = vrot.slane %v1029_v18, 2  ;;  %v1039_v47 = vmul.f32 %v1015_v26, %v2306_v62  ;;  %v1253_v24 = vrot.slane %v1252_v37, 2  ;;  %v1024_v50 = vadd.f32 %v1023_v42, %v1022_v60 }
 0x1c7   :  { %1090 = vrot.lane.b32.xlu0 %v1074_v54, %s1660_s22  ;;  %v1245_v23 = vadd.f32 %v1244_v46, %v1243_v59  ;;  %v1271_v48 = vrot.slane %v1270_v5, 2  ;;  %v1261_v15 = vadd.f32 %v1260_v28, %v1259_v8  ;;  %v1278_v32 = vmul.f32 %v1238_v44, %v2259_v43  ;;  %v1415_v28 = vld [vmem:[#allocation2 + $0x60] sm:$0xff]  ;;  %v1414_v44 = vld [vmem:[#allocation2 + $0x58] sm:$0xff] }
 0x1c8   :  { %v1060_v36 = vpop.permute.xlu1 %1059  ;;  %v1031_v52 = vadd.f32 %v1030_v38, %v1029_v18  ;;  %v1211_v14 = vadd.f32 %v1210_v25, %v1209_v21  ;;  %v1254_v61 = vadd.f32 %v1253_v24, %v1252_v37  ;;  %v1040_v17 = vmul.f32 %v1024_v50, %v2302_v9  ;;  %v1417_v25 = vld [vmem:[#allocation2 + $0x70] sm:$0xff]  ;;  %v1411_v24 = vld [vmem:[#allocation2 + $0x40] sm:$0xff] }
 0x1c9   :  { %v1078_v51 = vmul.f32 %v1060_v36, %v1038_v2  ;;  %v1318_v13 = vmul.f32 %v1297_v31, %v1278_v32  ;;  %v1262_v33 = vrot.slane %v1261_v15, 2  ;;  %v1272_v7 = vadd.f32 %v1271_v48, %v1270_v5  ;;  %v1413_v2 = vld [vmem:[#allocation2 + $0x50] sm:$0xff] }
 0x1ca   :  { %v1032_v11 = vrot.slane %v1031_v52, 1  ;;  %v1275_v27 = vmul.f32 %v1211_v14, %v2186_v3  ;;  %v1246_v56 = vrot.slane %v1245_v23, 1  ;;  %v1072_v63 = vpop.permute.xlu2 %1071  ;;  %v1255_v29 = vrot.slane %v1254_v61, 1  ;;  %v1405_v32 = vld [vmem:[#allocation2 + $0x10] sm:$0xff] }
 0x1cb   :  { %1335 = vrot.lane.b32.xlu1 %v1317_v55, %s1661_s1  ;;  %v1273_v12 = vrot.slane %v1272_v7, 1  ;;  %v1263_v54 = vadd.f32 %v1262_v33, %v1261_v15  ;;  %v1406_v15 = vld [vmem:[#allocation2 + $0x18] sm:$0xff] }
 0x1cc   :  { %v1064_v41 = vpop.permute.xlu0 %1063  ;;  %v1033_v19 = vadd.f32 %v1032_v11, %v1031_v52  ;;  %v1247_v59 = vadd.f32 %v1246_v56, %v1245_v23  ;;  %v1256_v60 = vadd.f32 %v1255_v29, %v1254_v61  ;;  %v1407_v23 = vld [vmem:[#allocation2 + $0x20] sm:$0xff]  ;;  %v1404_v61 = vld [vmem:[#allocation2 + $0x8] sm:$0xff] }
 0x1cd   :  { %v1079_v6 = vmul.f32 %v1064_v41, %v1039_v47  ;;  %v1274_v53 = vadd.f32 %v1273_v12, %v1272_v7  ;;  %v1264_v21 = vrot.slane %v1263_v54, 1  ;;  %v1410_v41 = vld [vmem:[#allocation2 + $0x38] sm:$0xff] }
 0x1ce   :  { %v1041_v45 = vmul.f32 %v1033_v19, %v2311_v16  ;;  %v1279_v38 = vmul.f32 %v1247_v59, %v2243_v57  ;;  %v1280_v8 = vmul.f32 %v1256_v60, %v2306_v62  ;;  %v1418_v62 = vld [vmem:[#allocation2 + $0x78] sm:$0xff] }
 0x1cf   :  { %1100 = vrot.lane.b32.xlu2 %v1079_v6, %s1660_s22  ;;  %1098 = vrot.lane.b32.xlu0 %v1078_v51, %s1660_s22  ;;  %v1282_v36 = vmul.f32 %v1274_v53, %v2311_v16  ;;  %v1265_v55 = vadd.f32 %v1264_v21, %v1263_v54  ;;  %v1416_v16 = vld [vmem:[#allocation2 + $0x68] sm:$0xff]  ;;  %v1409_v51 = vld [vmem:[#allocation2 + $0x30] sm:$0xff] }
 0x1d0   :  { %v1081_v3 = vmul.f32 %v1072_v63, %v1041_v45  ;;  %1423 = vmatpush.msra.mxu0 %v1418_v62  ;;  %v1408_v6 = vld [vmem:[#allocation2 + $0x28] sm:$0xff] }
 0x1d1   :  { %v1285_v30 = vpop.permute.xlu1 %1284  ;;  %v1281_v57 = vmul.f32 %v1265_v55, %v2302_v9  ;;  %v1412_v9 = vld [vmem:[#allocation2 + $0x48] sm:$0xff] }
 0x1d2   :  { %v1315_v18 = vmul.f32 %v1285_v30, %v1275_v27  ;;  %1424 = vmatpush.msra.mxu0 %v1417_v25 }
 0x1d3   :  { %1337 = vrot.lane.b32.xlu1 %v1318_v13, %s1661_s1  ;;  %v1313_v26 = vpop.permute.xlu2 %1312  ;;  %v1403_v13 = vld [vmem:[#allocation2] sm:$0xff] }
 0x1d4   :  { %v1068_v43 = vpop.permute.xlu0 %1067  ;;  %v1322_v52 = vmul.f32 %v1313_v26, %v1282_v36  ;;  %1425 = vmatpush.msra.mxu0 %v1416_v16 }
 0x1d5   :  { %v1080_v20 = vmul.f32 %v1068_v43, %v1040_v17 }
 0x1d6   :  { %1426 = vmatpush.msra.mxu0 %v1415_v28 }
 0x1d7   :  { %1102 = vrot.lane.b32.xlu2 %v1080_v20, %s1660_s22  ;;  %1331 = vrot.lane.b32.xlu0 %v1315_v18, %s1661_s1 }
 0x1d8   :  { %1427 = vmatpush.msra.mxu0 %v1414_v44 }
 0x1d9   :  { %v1301_v10 = vpop.permute.xlu1 %1300 }
 0x1da   :  { %v1319_v49 = vmul.f32 %v1301_v10, %v1279_v38  ;;  %1428 = vmatpush.msra.mxu0 %v1413_v2 }
 0x1db   :  { %1104 = vrot.lane.b32.xlu1 %v1081_v3, %s1660_s22 }
 0x1dc   :  { %1429 = vmatpush.msra.mxu0 %v1412_v9 }
 0x1dd   :  { %v1305_v1 = vpop.permute.xlu0 %1304 }
 0x1de   :  { %v1320_v37 = vmul.f32 %v1305_v1, %v1280_v8  ;;  %1430 = vmatpush.msra.mxu0 %v1411_v24 }
 0x1df   :  { %1339 = vrot.lane.b32.xlu0 %v1319_v49, %s1661_s1 }
 0x1e0   :  { %1341 = vrot.lane.b32.xlu2 %v1320_v37, %s1661_s1  ;;  %1431 = vmatpush.msra.mxu0 %v1410_v41 }
 0x1e1   :  { %v1309_v46 = vpop.permute.xlu1 %1308 }
 0x1e2   :  { %v1321_v5 = vmul.f32 %v1309_v46, %v1281_v57  ;;  %1432 = vmatpush.msra.mxu0 %v1409_v51 }
 0x1e3   :  { %1345 = vrot.lane.b32.xlu1 %v1322_v52, %s1661_s1 }
 0x1e4   :  { %1433 = vmatpush.msra.mxu0 %v1408_v6 }
 0x1e6   :  { %1434 = vmatpush.msra.mxu0 %v1407_v23 }
 0x1e7   :  { %1343 = vrot.lane.b32.xlu0 %v1321_v5, %s1661_s1 }
 0x1e8   :  { %1435 = vmatpush.msra.mxu0 %v1406_v15 }
 0x1ea   :  { %1436 = vmatpush.msra.mxu0 %v1405_v32 }
 0x1ec   :  { %1437 = vmatpush.msra.mxu0 %v1404_v61 }
 0x1ee   :  { %1438 = vmatpush.msra.mxu0 %v1403_v13 }
 0x214   :  { %v1095_v42 = vpop.permute.xlu2 %1094 }
 0x215   :  { %v1116_v33 = vadd.f32 %v1095_v42, %v2458_v34 }
 0x21c   :  { %v1334_v31 = vpop.permute.xlu2 %1333 }
 0x229   :  { %v1101_v50 = vpop.permute.xlu2 %1100 }
 0x22a   :  { %v1119_v34 = vadd.f32 %v1101_v50, %v2470_v4 }
 0x22d   :  { %v1093_v47 = vpop.permute.xlu1 %1092 }
 0x22e   :  { %v1115_v19 = vadd.f32 %v1093_v47, %v2426_v22  ;;  %v1509_v47 = vld [vmem:[%s2673_s3] ss:$0 sm:$0xff] }
 0x230   :  { %v1356_v27 = vadd.f32 %v1334_v31, %v1115_v19 }
 0x231   :  { %v1103_v17 = vpop.permute.xlu2 %1102 }
 0x232   :  { %v1364_v29 = vmul.f32 0.25, %v1356_v27  ;;  %v1120_v57 = vadd.f32 %v1103_v17, %v2463_v35 }
 0x234   :  { %v1379_v22 = vrot.slane %v1364_v29, 7 }
 0x235   :  { %v1097_v11 = vpop.permute.xlu1 %1096 }
 0x236   :  { %v1117_v7 = vadd.f32 %v1097_v11, %v2449_v39 }
 0x239   :  { %v1091_v48 = vpop.permute.xlu0 %1090 }
 0x23a   :  { %v1114_v45 = vadd.f32 %v1091_v48, %v2434_v40  ;;  %v1342_v54 = vpop.permute.xlu2 %1341 }
 0x23b   :  { %v1360_v38 = vadd.f32 %v1342_v54, %v1119_v34 }
 0x23d   :  { %v1336_v14 = vpop.permute.xlu1 %1335  ;;  %v1368_v26 = vmul.f32 0.25, %v1360_v38 }
 0x23e   :  { %v1357_v56 = vadd.f32 %v1336_v14, %v1116_v33 }
 0x23f   :  { %v1391_v4 = vrot.slane %v1368_v26, 3 }
 0x240   :  { %v1365_v18 = vmul.f32 0.25, %v1357_v56 }
 0x241   :  { %v1099_v30 = vpop.permute.xlu0 %1098 }
 0x242   :  { %v1382_v3 = vrot.slane %v1365_v18, 6  ;;  %v1118_v40 = vadd.f32 %v1099_v30, %v2437_v58 }
 0x245   :  { %v1338_v63 = vpop.permute.xlu1 %1337 }
 0x246   :  { %v1358_v43 = vadd.f32 %v1338_v63, %v1117_v7 }
 0x248   :  { %v1366_v12 = vmul.f32 0.25, %v1358_v43 }
 0x249   :  { %v1332_v20 = vpop.permute.xlu0 %1331 }
 0x24a   :  { %v1355_v59 = vadd.f32 %v1332_v20, %v1114_v45  ;;  %v1385_v39 = vrot.slane %v1366_v12, 5 }
 0x24c   :  { %v1363_v60 = vmul.f32 0.25, %v1355_v59 }
 0x24d   :  { %v1105_v10 = vpop.permute.xlu1 %1104 }
 0x24e   :  { %v1381_v53 = vsel %vm1380_vm7, %v1379_v22, %v1363_v60  ;;  %v1121_v36 = vadd.f32 %v1105_v10, %v2446_v0 }
 0x24f   :  { %v1384_v21 = vsel %vm1383_vm8, %v1382_v3, %v1381_v53 }
 0x250   :  { %v1387_v8 = vsel %vm1386_vm9, %v1385_v39, %v1384_v21 }
 0x251   :  { %v1340_v49 = vpop.permute.xlu0 %1339 }
 0x252   :  { %v1359_v1 = vadd.f32 %v1340_v49, %v1118_v40 }
 0x254   :  { %v1367_v37 = vmul.f32 0.25, %v1359_v1 }
 0x255   :  { %v1346_v55 = vpop.permute.xlu1 %1345 }
 0x256   :  { %v1388_v52 = vrot.slane %v1367_v37, 4  ;;  %v1362_v46 = vadd.f32 %v1346_v55, %v1121_v36 }
 0x258   :  { %v1390_v5 = vsel %vm1389_vm11, %v1388_v52, %v1387_v8  ;;  %v1370_v58 = vmul.f32 0.25, %v1362_v46 }
 0x259   :  { %v1344_v62 = vpop.permute.xlu0 %1343  ;;  %v1393_v25 = vsel %vm1392_vm12, %v1391_v4, %v1390_v5 }
 0x25a   :  { %v1361_v42 = vadd.f32 %v1344_v62, %v1120_v57  ;;  %v1397_v44 = vrot.slane %v1370_v58, 1 }
 0x25c   :  { %v1369_v16 = vmul.f32 0.25, %v1361_v42 }
 0x25e   :  { %v1394_v28 = vrot.slane %v1369_v16, 2 }
 0x260   :  { %v1396_v2 = vsel %vm1395_vm13, %v1394_v28, %v1393_v25 }
 0x261   :  { %v1399_v0 = vsel %vm1398_vm14, %v1397_v44, %v1396_v2 }
 0x262   :  { %v1401_v35 = vsel %vm503_vm10, %v1399_v0, 0.0  ;;  %1477 = vmatmul.msk.f32.vlgmr.msra.gmra.mxu0 %vm503_vm10, %v1399_v0 }
 0x263   :  { %1402 = vst [vmem:[#allocation5] sm:$0xff] %v1401_v35 }
 0x264   :  { %1454 = dma.vmem_to_hbm [thread:$0]  %s1450_s24, 128, %s1452_s2, [#allocation4]  }
 0x2df   :  { %v1440_v9 = vpop.f32.mrf.mxu0 }
 0x2e0   :  { %v1441_v24 = vadd.f32 %v1509_v47, %v1440_v9 }
 0x2e2   :  { %1443 = vst [vmem:[#allocation6] sm:$0xff] %v1441_v24 }
 0x2e3   :  { %1465 = dma.vmem_to_hbm [thread:$0]  %s1461_s30, 128, %s1463_s8, [#allocation7]  }
 0x2e4   :  { %1648 = dma.done.wait [#allocation4], 128  }
 0x2e5   :  { %1649 = vsyncadd [#allocation4], 4294967168 }
 0x2e6   :  { %1650 = dma.done.wait [#allocation7], 128  }
 0x2e7   :  { %1651 = vsyncadd [#allocation7], 4294967168 }
 0x2e8   :  { %1474 = vsyncpa [#allocation3], 1 }
 0x2e9   :  { %1475 = vsyncpa [#allocation4], 1 }
 0x2ea   :  { %1476 = vsyncpa [#allocation7], 1 }

</bundles_post_ra>
